<compile_context>
chip_gen: v7x
topology: tpu7x:2x2x1
jax: 0.10.0
libtpu: 0.0.40
codegen_flags: <defaults>
</compile_context>

<pallas_src>
import jax
import jax.numpy as jnp
import numpy as np
from jax.experimental import pallas as pl
from jax.experimental.pallas import tpu as pltpu

# ------------------------- problem sizes (small) ----------------------------
B = 32           # batch: grid of 2 steps -> both v7x TensorCores get work
TB = 16          # batch tile (bf16 sublane pack); use 128-256 for real batches
C = 3            # in_channels
H = W = 16       # spatial
HW = H * W       # 256 lanes: lane-dense input block
FEAT = 2048      # backbone feature dim (fixed by the module)
DIM_Z = 16       # encoding dim
N_CHARTS = 4     # number of atlas charts
PROJ_DIM = 32    # projection head dim

NZ = N_CHARTS * DIM_Z          # 64: flattened chart-coords width
CAT_PAD = 128                  # lanes for the fused coords+q weight (68 -> 128)
OUT_PAD = 128                  # lane-dense output width (32 -> 128)


# ------------------------------ Pallas kernel -------------------------------
def simclr_mfld_kernel(
    x_ref,       # (TB, C, HW)        raw input tile (NCHW, spatial flattened), f32
    wstem_ref,   # (C, FEAT)          stand-in backbone linear, bf16
    wcat_ref,    # (FEAT, CAT_PAD)    fused [coords | q] weights, bf16
    bcat_ref,    # (1, CAT_PAD)       fused biases (+ folded b_stem @ w_cat), f32
    w1_ref,      # (NZ, NZ)           block-diagonal proj-head layer 1, bf16
    w2_ref,      # (NZ, OUT_PAD)      stacked (lane-padded) proj-head layer 2, bf16
    expand_ref,  # (N_CHARTS, NZ)     0/1 chart -> coord-lane expansion, bf16
    o_ref,       # (TB, OUT_PAD)
):
    # ---- fused global average pool: (TB, C, 256) -> (TB, C) on the XLU -----
    pooled = jnp.mean(x_ref[...], axis=-1)

    # ---- stand-in backbone linear: (TB, C) @ (C, FEAT) -> (TB, FEAT) -------
    # (b_stem is folded into bcat offline, so no bias add here.)
    feat = jnp.dot(pooled.astype(jnp.bfloat16), wstem_ref[...],
                   preferred_element_type=jnp.float32)

    # ---- fused coords + q-logits: one lane-dense K=2048 MXU contraction ----
    y = jnp.dot(feat.astype(jnp.bfloat16), wcat_ref[...],
                preferred_element_type=jnp.float32) + bcat_ref[...]   # (TB, 128)
    coords = y[:, :NZ]                        # (TB, 64) = concat_n Linear_n(feat)
    logits = y[:, NZ:NZ + N_CHARTS]           # (TB, 4)

    # ---- q = softmax(logits, axis=-1) (EUP reciprocal) ---------------------
    m = jnp.max(logits, axis=-1, keepdims=True)
    e = jnp.exp(logits - m)
    q = e * pl.reciprocal(jnp.sum(e, axis=-1, keepdims=True), approx=True)

    # ---- projection heads: block-diag W1 -> ReLU -> gated stacked W2 -------
    h = jnp.maximum(
        jnp.dot(coords.astype(jnp.bfloat16), w1_ref[...],
                preferred_element_type=jnp.float32), 0.0)             # (TB, 64)

    # Expand q (TB, 4) -> (TB, 64) with a tiny 0/1 matmul (no cross-lane
    # reshape); gating before W2 makes the chart-sum part of the contraction.
    q_rep = jnp.dot(q.astype(jnp.bfloat16), expand_ref[...],
                    preferred_element_type=jnp.float32)               # (TB, 64)

    out = jnp.dot((q_rep * h).astype(jnp.bfloat16), w2_ref[...],
                  preferred_element_type=jnp.float32)                 # (TB, 128)
    o_ref[...] = out.astype(o_ref.dtype)


# ------------------------------ param packing --------------------------------
def pack_params(p):
    """Pack per-chart weights into fused, lane-friendly matrices (one-time)."""
    f32 = jnp.float32
    # fused [coords | q] weight over the shared FEAT contraction (chart-major)
    w_coords_flat = jnp.transpose(p["w_coords"], (1, 0, 2)).reshape(FEAT, NZ)
    w_cat = jnp.concatenate([w_coords_flat, p["w_q"]], axis=1)          # (2048, 68)
    w_cat = jnp.pad(w_cat, ((0, 0), (0, CAT_PAD - w_cat.shape[1])))     # (2048, 128)
    b_cat = jnp.concatenate([p["b_coords"].reshape(1, NZ), p["b_q"]], axis=1)
    b_cat = jnp.pad(b_cat, ((0, 0), (0, CAT_PAD - b_cat.shape[1])))     # (1, 128)

    # fold the stand-in backbone bias through the fused weight (exact):
    #   y = (pooled @ Ws + bs) @ Wc + bc = pooled @ Ws @ Wc + (bs @ Wc + bc)
    # composed in f32; weights are cast to bf16 exactly once below.
    b_cat = b_cat.astype(f32) + p["b_stem"].astype(f32) @ w_cat.astype(f32)

    # block-diagonal proj-head layer 1, stacked (lane-padded) layer 2
    w1_bd = jax.scipy.linalg.block_diag(*p["w_proj1"])                  # (64, 64)
    w2_stack = jnp.pad(p["w_proj2"].reshape(NZ, PROJ_DIM),
                       ((0, 0), (0, OUT_PAD - PROJ_DIM)))               # (64, 128)

    # 0/1 chart -> coord-lane expansion matrix (values exact in bf16)
    col = jax.lax.broadcasted_iota(jnp.int32, (N_CHARTS, NZ), 1) // DIM_Z
    row = jax.lax.broadcasted_iota(jnp.int32, (N_CHARTS, NZ), 0)
    expand = (col == row).astype(f32)                                   # (4, 64)

    bf16 = jnp.bfloat16
    return {
        "w_stem": p["w_stem"].astype(bf16),
        "w_cat": w_cat.astype(bf16),
        "b_cat": b_cat.astype(f32),
        "w1_bd": w1_bd.astype(bf16),
        "w2_stack": w2_stack.astype(bf16),
        "expand": expand.astype(bf16),
    }


# ------------------------------ wrapper --------------------------------------
def simclr_mfld_forward(x_nchw, packed):
    b, c, h, w = x_nchw.shape
    hw = h * w
    # metadata-only reshape to a lane-dense (B, C, H*W) view; the pool itself
    # runs inside the kernel.
    x3 = x_nchw.reshape(b, c, hw).astype(jnp.float32)
    b_pad = ((b + TB - 1) // TB) * TB
    if b_pad != b:
        # Padded rows see zero input -> logits = folded bias -> finite softmax;
        # their outputs are sliced off below and never read.
        x3 = jnp.pad(x3, ((0, b_pad - b), (0, 0), (0, 0)))

    # constant-index weights: fetched once -> single-buffered (no dead VMEM)
    def resident(shape):
        return pl.BlockSpec(shape, lambda i: (0,) * len(shape),
                            pipeline_mode=pl.Buffered(1))

    out = pl.pallas_call(
        simclr_mfld_kernel,
        out_shape=jax.ShapeDtypeStruct((b_pad, OUT_PAD), jnp.float32),
        grid=(b_pad // TB,),
        in_specs=[
            pl.BlockSpec((TB, c, hw), lambda i: (i, 0, 0)),   # streamed input tile
            resident((c, FEAT)),
            resident((FEAT, CAT_PAD)),
            resident((1, CAT_PAD)),
            resident((NZ, NZ)),
            resident((NZ, OUT_PAD)),
            resident((N_CHARTS, NZ)),
        ],
        out_specs=pl.BlockSpec((TB, OUT_PAD), lambda i: (i, 0)),  # lane-dense vst
        compiler_params=pltpu.CompilerParams(
            dimension_semantics=("parallel",),   # v7x: shard batch over 2 TCs
        ),
    )(x3, packed["w_stem"], packed["w_cat"], packed["b_cat"],
      packed["w1_bd"], packed["w2_stack"], packed["expand"])
    return out[:b, :PROJ_DIM]


# ------------------------- pure-JAX f32 reference ----------------------------
def reference_forward(x_nchw, p):
    b, c, h, w = x_nchw.shape
    pooled = jnp.mean(x_nchw.reshape(b, c, h * w).astype(jnp.float32), axis=-1)
    feat = pooled @ p["w_stem"] + p["b_stem"]
    logits = feat @ p["w_q"] + p["b_q"]
    q = jax.nn.softmax(logits, axis=1)
    coords = jnp.einsum("bf,nfd->bnd", feat, p["w_coords"]) + p["b_coords"][None]
    hdn = jnp.maximum(jnp.einsum("bnd,nde->bne", coords, p["w_proj1"]), 0.0)
    proj = jnp.einsum("bne,nep->bnp", hdn, p["w_proj2"])
    return jnp.sum(q[:, :, None] * proj, axis=1)


# ------------------------------ main ------------------------------------------
if __name__ == "__main__":
    key = jax.random.PRNGKey(0)
    keys = jax.random.split(key, 10)

    # deterministic synthetic parameters (weights stored as (in, out))
    params = {
        "w_stem":   0.05 * jax.random.normal(keys[0], (C, FEAT), jnp.float32),
        "b_stem":   0.05 * jax.random.normal(keys[1], (1, FEAT), jnp.float32),
        "w_coords": 0.02 * jax.random.normal(keys[2], (N_CHARTS, FEAT, DIM_Z), jnp.float32),
        "b_coords": 0.02 * jax.random.normal(keys[3], (N_CHARTS, DIM_Z), jnp.float32),
        "w_q":      0.02 * jax.random.normal(keys[4], (FEAT, N_CHARTS), jnp.float32),
        "b_q":      0.02 * jax.random.normal(keys[5], (1, N_CHARTS), jnp.float32),
        "w_proj1":  0.10 * jax.random.normal(keys[6], (N_CHARTS, DIM_Z, DIM_Z), jnp.float32),
        "w_proj2":  0.10 * jax.random.normal(keys[7], (N_CHARTS, DIM_Z, PROJ_DIM), jnp.float32),
    }

    x = jax.random.normal(keys[8], (B, C, H, W), jnp.float32)   # NCHW input

    packed = pack_params(params)
    out = jax.block_until_ready(simclr_mfld_forward(x, packed))

    ref = jax.block_until_ready(reference_forward(x, params))
    assert out.shape == (B, PROJ_DIM)
    # Tolerance loosened vs the f32 reference: the K=2048 contraction and the
    # proj-head matmuls use bf16 inputs (f32 accumulation) and the softmax uses
    # the EUP approximate reciprocal.
    np.testing.assert_allclose(np.asarray(out), np.asarray(ref), rtol=2e-2, atol=2e-3)

    print("KERNEL_OK")
</pallas_src>

<mosaic_0001>
module attributes {stable_mosaic.version = 11 : i64} {
  func.func @simclr_mfld_kernel(%arg0: i32, %arg1: memref<16x3x256xf32, #tpu.memory_space<vmem>>, %arg2: memref<3x2048xbf16, #tpu.memory_space<vmem>>, %arg3: memref<2048x128xbf16, #tpu.memory_space<vmem>>, %arg4: memref<1x128xf32, #tpu.memory_space<vmem>>, %arg5: memref<64x64xbf16, #tpu.memory_space<vmem>>, %arg6: memref<64x128xbf16, #tpu.memory_space<vmem>>, %arg7: memref<4x64xbf16, #tpu.memory_space<vmem>>, %arg8: memref<16x128xf32, #tpu.memory_space<vmem>>) attributes {dimension_semantics = [#tpu.dimension_semantics<parallel>], iteration_bounds = array<i64: 2>, scalar_prefetch = 0 : i64, scratch_operands = 0 : i64, tpu.core_type = #tpu.core_type<tc>, window_params = [{transform_indices = @transform_0, window_bounds = array<i64: 16, 3, 256>}, {pipeline_mode = #tpu.pipeline_mode<synchronous>, transform_indices = @transform_1, window_bounds = array<i64: 3, 2048>}, {pipeline_mode = #tpu.pipeline_mode<synchronous>, transform_indices = @transform_2, window_bounds = array<i64: 2048, 128>}, {pipeline_mode = #tpu.pipeline_mode<synchronous>, transform_indices = @transform_3, window_bounds = array<i64: 1, 128>}, {pipeline_mode = #tpu.pipeline_mode<synchronous>, transform_indices = @transform_4, window_bounds = array<i64: 64, 64>}, {pipeline_mode = #tpu.pipeline_mode<synchronous>, transform_indices = @transform_5, window_bounds = array<i64: 64, 128>}, {pipeline_mode = #tpu.pipeline_mode<synchronous>, transform_indices = @transform_6, window_bounds = array<i64: 4, 64>}, {transform_indices = @transform_7, window_bounds = array<i64: 16, 128>}]} {
    %c0 = arith.constant 0 : index
    %c0_0 = arith.constant 0 : index
    %c0_1 = arith.constant 0 : index
    %0 = vector.load %arg1[%c0, %c0_0, %c0_1] : memref<16x3x256xf32, #tpu.memory_space<vmem>>, vector<16x3x256xf32>
    %cst = arith.constant dense<0.000000e+00> : vector<16x3xf32>
    %1 = vector.multi_reduction <add>, %0, %cst [2] : vector<16x3x256xf32> to vector<16x3xf32>
    %cst_2 = arith.constant 2.560000e+02 : f32
    %2 = vector.broadcast %cst_2 : f32 to vector<16x3xf32>
    %3 = arith.divf %1, %2 : vector<16x3xf32>
    %4 = arith.truncf %3 : vector<16x3xf32> to vector<16x3xbf16>
    %c0_3 = arith.constant 0 : index
    %c0_4 = arith.constant 0 : index
    %5 = vector.load %arg2[%c0_3, %c0_4] : memref<3x2048xbf16, #tpu.memory_space<vmem>>, vector<3x2048xbf16>
    %cst_5 = arith.constant dense<0.000000e+00> : vector<16x2048xf32>
    %6 = tpu.matmul %4, %5, %cst_5 {dimension_numbers = #tpu.dot_dimension_numbers<[1], [0], [0], [1], [0, 0, 1, 1], [], []>} : vector<16x3xbf16>, vector<3x2048xbf16>, vector<16x2048xf32> -> vector<16x2048xf32>
    %7 = arith.truncf %6 : vector<16x2048xf32> to vector<16x2048xbf16>
    %c0_6 = arith.constant 0 : index
    %c0_7 = arith.constant 0 : index
    %8 = vector.load %arg3[%c0_6, %c0_7] : memref<2048x128xbf16, #tpu.memory_space<vmem>>, vector<2048x128xbf16>
    %cst_8 = arith.constant dense<0.000000e+00> : vector<16x128xf32>
    %9 = tpu.matmul %7, %8, %cst_8 {dimension_numbers = #tpu.dot_dimension_numbers<[1], [0], [0], [1], [0, 0, 1, 1], [], []>} : vector<16x2048xbf16>, vector<2048x128xbf16>, vector<16x128xf32> -> vector<16x128xf32>
    %c0_9 = arith.constant 0 : index
    %c0_10 = arith.constant 0 : index
    %10 = vector.load %arg4[%c0_9, %c0_10] : memref<1x128xf32, #tpu.memory_space<vmem>>, vector<1x128xf32>
    %11 = vector.broadcast %10 : vector<1x128xf32> to vector<16x128xf32>
    %12 = arith.addf %9, %11 : vector<16x128xf32>
    %13 = vector.extract_strided_slice %12 {offsets = [0, 0], sizes = [16, 64], strides = [1, 1]} : vector<16x128xf32> to vector<16x64xf32>
    %14 = vector.extract_strided_slice %12 {offsets = [0, 64], sizes = [16, 4], strides = [1, 1]} : vector<16x128xf32> to vector<16x4xf32>
    %cst_11 = arith.constant dense<0xFF800000> : vector<16xf32>
    %15 = vector.multi_reduction <maximumf>, %14, %cst_11 [1] : vector<16x4xf32> to vector<16xf32>
    %16 = vector.shape_cast %15 : vector<16xf32> to vector<16x1xf32>
    %17 = vector.broadcast %16 : vector<16x1xf32> to vector<16x4xf32>
    %18 = arith.subf %14, %17 : vector<16x4xf32>
    %19 = math.exp %18 : vector<16x4xf32>
    %cst_12 = arith.constant dense<0.000000e+00> : vector<16xf32>
    %20 = vector.multi_reduction <add>, %19, %cst_12 [1] : vector<16x4xf32> to vector<16xf32>
    %21 = vector.shape_cast %20 : vector<16xf32> to vector<16x1xf32>
    %22 = tpu.reciprocal %21 {approx = true} : vector<16x1xf32> -> vector<16x1xf32>
    %23 = vector.broadcast %22 : vector<16x1xf32> to vector<16x4xf32>
    %24 = arith.mulf %19, %23 : vector<16x4xf32>
    %25 = arith.truncf %13 : vector<16x64xf32> to vector<16x64xbf16>
    %c0_13 = arith.constant 0 : index
    %c0_14 = arith.constant 0 : index
    %26 = vector.load %arg5[%c0_13, %c0_14] : memref<64x64xbf16, #tpu.memory_space<vmem>>, vector<64x64xbf16>
    %cst_15 = arith.constant dense<0.000000e+00> : vector<16x64xf32>
    %27 = tpu.matmul %25, %26, %cst_15 {dimension_numbers = #tpu.dot_dimension_numbers<[1], [0], [0], [1], [0, 0, 1, 1], [], []>} : vector<16x64xbf16>, vector<64x64xbf16>, vector<16x64xf32> -> vector<16x64xf32>
    %cst_16 = arith.constant 0.000000e+00 : f32
    %28 = vector.broadcast %cst_16 : f32 to vector<16x64xf32>
    %29 = arith.maximumf %27, %28 : vector<16x64xf32>
    %30 = arith.truncf %24 : vector<16x4xf32> to vector<16x4xbf16>
    %c0_17 = arith.constant 0 : index
    %c0_18 = arith.constant 0 : index
    %31 = vector.load %arg7[%c0_17, %c0_18] : memref<4x64xbf16, #tpu.memory_space<vmem>>, vector<4x64xbf16>
    %cst_19 = arith.constant dense<0.000000e+00> : vector<16x64xf32>
    %32 = tpu.matmul %30, %31, %cst_19 {dimension_numbers = #tpu.dot_dimension_numbers<[1], [0], [0], [1], [0, 0, 1, 1], [], []>} : vector<16x4xbf16>, vector<4x64xbf16>, vector<16x64xf32> -> vector<16x64xf32>
    %33 = arith.mulf %32, %29 : vector<16x64xf32>
    %34 = arith.truncf %33 : vector<16x64xf32> to vector<16x64xbf16>
    %c0_20 = arith.constant 0 : index
    %c0_21 = arith.constant 0 : index
    %35 = vector.load %arg6[%c0_20, %c0_21] : memref<64x128xbf16, #tpu.memory_space<vmem>>, vector<64x128xbf16>
    %cst_22 = arith.constant dense<0.000000e+00> : vector<16x128xf32>
    %36 = tpu.matmul %34, %35, %cst_22 {dimension_numbers = #tpu.dot_dimension_numbers<[1], [0], [0], [1], [0, 0, 1, 1], [], []>} : vector<16x64xbf16>, vector<64x128xbf16>, vector<16x128xf32> -> vector<16x128xf32>
    %c0_23 = arith.constant 0 : index
    %c0_24 = arith.constant 0 : index
    %37 = vector.load %arg8[%c0_23, %c0_24] : memref<16x128xf32, #tpu.memory_space<vmem>>, vector<16x128xf32>
    tpu.vector_store %arg8[%c0_23, %c0_24], %36 {strides = array<i32>} : memref<16x128xf32, #tpu.memory_space<vmem>>, vector<16x128xf32>,
    return
  }
  func.func @transform_0(%arg0: i32) -> (i32, i32, i32) {
    %c0_i32 = arith.constant 0 : i32
    %c0_i32_0 = arith.constant 0 : i32
    %c0_i32_1 = arith.constant 0 : i32
    return %arg0, %c0_i32, %c0_i32_0 : i32, i32, i32
  }
  func.func @transform_1(%arg0: i32) -> (i32, i32) {
    %c0_i32 = arith.constant 0 : i32
    %c0_i32_0 = arith.constant 0 : i32
    %c0_i32_1 = arith.constant 0 : i32
    return %c0_i32, %c0_i32_0 : i32, i32
  }
  func.func @transform_2(%arg0: i32) -> (i32, i32) {
    %c0_i32 = arith.constant 0 : i32
    %c0_i32_0 = arith.constant 0 : i32
    %c0_i32_1 = arith.constant 0 : i32
    return %c0_i32, %c0_i32_0 : i32, i32
  }
  func.func @transform_3(%arg0: i32) -> (i32, i32) {
    %c0_i32 = arith.constant 0 : i32
    %c0_i32_0 = arith.constant 0 : i32
    %c0_i32_1 = arith.constant 0 : i32
    return %c0_i32, %c0_i32_0 : i32, i32
  }
  func.func @transform_4(%arg0: i32) -> (i32, i32) {
    %c0_i32 = arith.constant 0 : i32
    %c0_i32_0 = arith.constant 0 : i32
    %c0_i32_1 = arith.constant 0 : i32
    return %c0_i32, %c0_i32_0 : i32, i32
  }
  func.func @transform_5(%arg0: i32) -> (i32, i32) {
    %c0_i32 = arith.constant 0 : i32
    %c0_i32_0 = arith.constant 0 : i32
    %c0_i32_1 = arith.constant 0 : i32
    return %c0_i32, %c0_i32_0 : i32, i32
  }
  func.func @transform_6(%arg0: i32) -> (i32, i32) {
    %c0_i32 = arith.constant 0 : i32
    %c0_i32_0 = arith.constant 0 : i32
    %c0_i32_1 = arith.constant 0 : i32
    return %c0_i32, %c0_i32_0 : i32, i32
  }
  func.func @transform_7(%arg0: i32) -> (i32, i32) {
    %c0_i32 = arith.constant 0 : i32
    %c0_i32_0 = arith.constant 0 : i32
    return %arg0, %c0_i32 : i32, i32
  }
}

</mosaic_0001>

<bundles_post_ra>
// kernel: tpu_custom_call.1
= control target key start
LH: loop header
LB: loop body
LE: loop exit
PB: predicated region body
PF: predicated region fallthrough
CT: control target
= control target key end

     0   :  { %12 = vsyncpa [#allocation3], 0  ;;  %s3993_s0 = inlined_call_operand.vmem [shape: f32[32,3,256], index: 0, kind: input, shape index: {}]   ;;  %s3994_s1 = inlined_call_operand.vmem [shape: bf16[3,2048], index: 1, kind: input, shape index: {}]   ;;  %s3995_s2 = inlined_call_operand.hbm [shape: bf16[2048,128], index: 2, kind: input, shape index: {}]   ;;  %s3996_s3 = inlined_call_operand.vmem [shape: f32[1,128], index: 3, kind: input, shape index: {}]   ;;  %s3997_s4 = inlined_call_operand.vmem [shape: bf16[64,64], index: 4, kind: input, shape index: {}]   ;;  %s3998_s5 = inlined_call_operand.vmem [shape: bf16[64,128], index: 5, kind: input, shape index: {}]   ;;  %s3999_s6 = inlined_call_operand.vmem [shape: bf16[4,64], index: 6, kind: input, shape index: {}]   ;;  %s4000_s7 = inlined_call_operand.hbm [shape: f32[32,128], index: 7, kind: output, shape index: {}]  }
   0x1   :  { %13 = vsyncpa [#allocation4], 0 }
   0x2   :  { %15 = vsyncpa [#allocation4 + $0x1], 0  ;;  %s3536_s24 = smov 0   ;;  %s3538_s25 = smov 0  }
   0x3   :  { %s3540_s26 = smov 0   ;;  %s3542_s27 = smov 0  }
   0x4 LB: > { %s3557_s28 = sadd.s32 4294967295, %s3482_s27   ;;  %s2781_s29 = sadd.s32 4294967294, %s3482_s27   ;;  %s3482_s27 = sphi %s3542_s27, %s4016_s27   ;;  %s3478_s26 = sphi %s3540_s26, %s4015_s26   ;;  %s3474_s25 = sphi %s3538_s25, %s4014_s25   ;;  %s3470_s24 = sphi %s3536_s24, %s4013_s24  }
   0x5   : > { %s3561_s30 = sadd.s32 1, %s3482_s27   ;;  %s180_s8 = sadd.s32 1, %s3478_s26 }
   0x6   : > { %s177_s9 = ssub.s32 %s3482_s27, %s3561_s30  ;;  %p190_p0 = scmp.ne.s32.totalorder %s3478_s26, %s3474_s25 }
   0x7   : > { %p178_p1 = scmp.eq.s32.totalorder %s177_s9, 0  ;;  %p191_p2 = scmp.eq.s32.totalorder %s3557_s28, 1 }
   0x8   : > { %p196_p3 = scmp.ne.s32.totalorder %s3474_s25, %s3470_s24  ;;  %p197_p4 = scmp.eq.s32.totalorder %s2781_s29, 1 }
   0x9   : > { %s3572_s10 = scalar_select %p178_p1, %s3478_s26, %s180_s8  }
   0xa   : > { %p3574_p5 = por %p191_p2, %p190_p0  ;;  %p3578_p6 = por %p197_p4, %p196_p3 }
   0xb   : > { %p2782_p7 = scmp.ge.s32.totalorder %s3482_s27, 1  ;;  %p204_p8 = scmp.lt.s32.totalorder %s3482_s27, 3 }
   0xc   : > { %s4004_s11 = scalar_select %p3574_p5, 1, 0 }
   0xd   : > { %s4005_s12 = scalar_select %p3578_p6, 1, 0 }
   0xe   : > { %p4001_p9 = scmp.eq.s32.totalorder %s3557_s28, 0  ;;  %p3585_p10 = pnand %p2782_p7, %p204_p8 }
   0xf   : > { %s3484_s14 = smov [#allocation2]   ;;  %s3388_s19 = scalar_lea.hbm %s3995_s2, 16384 }
  0x10   : > { %s4006_s13 = scalar_select %p3585_p10, 1, 0 }
  0x11   : > { %s219_s15 = sshll.u32 %s3484_s14, 4  ;;  %p3170_p11 = pneg %p3585_p10  ;;  %s220_s15 = int_to_ptr.vmem [resolvable:$true] %s219_s15 }
  0x12   : > { %p3389_p13 = scmp.ne.s32.totalorder %s3995_s2, %s3388_s19  ;;  %p3395_p3 = scmp.lt.u32.totalorder %s3388_s19, %s3995_s2 }
  0x13   : > { %p3593_p12 = pnand %p4001_p9, %p3170_p11 }
  0x15   : > { %p3390_p0 = pneg %p3593_p12 }
  0x17   : > { %p3391_p1 = pnand %p3390_p0, %p3389_p13 }
  0x19   : > { %p3392_p2 = pneg %p3391_p1 }
  0x1b   : > { %p3397_p4 = pnand %p3395_p3, %p3392_p2 }
  0x1d   : > { %3400 = shalt.err (!%p3397_p4)
}
  0x1e   : > { %s3401_s29 = scalar_lea.vmem %s220_s15, 16384  ;;  %p3409_p9 = scmp.lt.s32.totalorder %s220_s15, %s220_s15 }
  0x1f   : > { %p3402_p7 = scmp.ne.s32.totalorder %s220_s15, %s3401_s29  ;;  %p3410_p6 = scmp.lt.s32.totalorder %s3401_s29, %s3401_s29 }
  0x21   : > { %p3404_p8 = pnand %p3402_p7, %p3390_p0  ;;  %p3411_p5 = por %p3410_p6, %p3409_p9 }
  0x23   : > { %p3405_p11 = pneg %p3404_p8 }
  0x25   : > { %p3412_p10 = pnand %p3411_p5, %p3405_p11 }
  0x27   : > { %3415 = shalt.err (!%p3412_p10)
}
  0x28   : > { %s3485_s8 = smov 64   ;;  %s3486_s9 = smov 4  }
  0x29   : > { %3173 = dma.hbm_to_vmem [thread:$0]  (!%p3593_p12), %s3995_s2, 16384, %s220_s15, [#allocation3], %s3485_s8, %s3485_s8, %s3486_s9  }
  0x2a   : > { %p4008_p13 = scmp.ne.s32.totalorder %s4006_s13, 0 }
  0x2b   : > { %p4009_p1 = scmp.eq.s32.totalorder (!%p4008_p13), %s3557_s28, 0 }
  0x2c   : > { %257 = sbr.rel (%p4008_p13) target bundleno = 1774 (0x6ee), region = 48 }
  0x33   : > { %3461 = dma.done.wait (%p4009_p1), [#allocation3], 16384   ;;  %p4010_p0 = pmov %p4009_p1 }
  0x34   : > { %s2788_s18 = sshll.u32 %s3557_s28, 4  ;;  %v513_v0 = vlaneseq  ;;  %vm363_vm0 = vcmask 1042432   ;;  %vm677_vm1 = vcmask 1040384   ;;  %vm678_vm2 = vcmask 1041408   ;;  %s3492_s29 = smov 64  }
  0x35   : > { %3463 = vsyncadd (%p4010_p0), [#allocation3], 4294950912  ;;  %p291_p5 = scmp.lt.s32.totalorder %s2788_s18, 31  ;;  %vm579_vm3 = vcmask 1041409   ;;  %vm581_vm4 = vcmask 1042434   ;;  %vm583_vm5 = vcmask 1043459  }
  0x36   : > { %v514_v1 = vand.u32 127, %v513_v0  ;;  %v3620_v2 = vshrl.u32 %v513_v0, 7  ;;  %vm585_vm6 = vcmask 1044484   ;;  %vm587_vm7 = vcmask 1045509   ;;  %s287_s21 = sand.u32 1, %s3474_s25   ;;  %s2945_s8 = sshll.u32 %s3557_s28, 8 }
  0x37   : > { %s4018_s18 = smov (!%p291_p5, %s2788_s18), 31  ;;  %vm589_vm8 = vcmask 1046534   ;;  %vm591_vm9 = vcmask 1047559   ;;  %vm673_vm10 = vcmask 23552   ;;  %vm3491_vm11 = vmmov 0   ;;  %s2787_s22 = sshll.u32 %s287_s21, 4 }
  0x38   : > { %v3623_v3 = vsub.s32 %v514_v1, %v3620_v2  ;;  %s2944_s15 = sshll.u32 %s4018_s18, 3  ;;  %vm2448_vm12 = vcmask 556544   ;;  %vm2513_vm13 = vcmask 523264   ;;  %vm2469_vm14 = vcmask 31744   ;;  %s289_s23 = scalar_lea.vmem [#allocation5], %s2787_s22 }
  0x39   : > { %s3628_s19 = scalar_lea.vmem %s3993_s0, %s2944_s15  ;;  %s3950_s17 = scalar_lea.hbm %s4000_s7, %s2945_s8 }
  0x3a   : > { %v307_v4 = vld [vmem:[%s3628_s19 + $0x40] sm:$0x77]  ;;  %v308_v6 = vld [vmem:[%s3628_s19 + $0x48] sm:$0x77]  ;;  %v309_v12 = vld [vmem:[%s3628_s19 + $0x50] sm:$0x77] }
  0x3b   : > { %v299_v5 = vld [vmem:[%s3628_s19] sm:$0x77]  ;;  %v339_v7 = vcombine.high %v307_v4, %v307_v4  ;;  %v404_v8 = vsel %vm363_vm0, %v307_v4, 0.0  ;;  %v300_v11 = vld [vmem:[%s3628_s19 + $0x8] sm:$0x77]  ;;  %v340_v13 = vcombine.high %v308_v6, %v308_v6  ;;  %v409_v14 = vsel %vm363_vm0, %v308_v6, 0.0 }
  0x3c   : > { %v331_v9 = vcombine.high %v299_v5, %v299_v5  ;;  %v364_v10 = vsel %vm363_vm0, %v299_v5, 0.0  ;;  %v332_v15 = vcombine.high %v300_v11, %v300_v11  ;;  %v301_v16 = vld [vmem:[%s3628_s19 + $0x10] sm:$0x77]  ;;  %v369_v19 = vsel %vm363_vm0, %v300_v11, 0.0  ;;  %v310_v21 = vld [vmem:[%s3628_s19 + $0x58] sm:$0x77] }
  0x3d   : > { %v405_v17 = vsel %vm363_vm0, %v339_v7, 0.0  ;;  %v341_v20 = vcombine.high %v309_v12, %v309_v12  ;;  %v410_v24 = vsel %vm363_vm0, %v340_v13, 0.0  ;;  %v302_v26 = vld [vmem:[%s3628_s19 + $0x18] sm:$0x77]  ;;  %v414_v27 = vsel %vm363_vm0, %v309_v12, 0.0  ;;  %s3952_s18 = scalar_lea.sflag [#allocation4], %s287_s21 }
  0x3e   : > { %v365_v18 = vsel %vm363_vm0, %v331_v9, 0.0  ;;  %v406_v22 = vadd.f32 %v405_v17, %v404_v8  ;;  %v370_v25 = vsel %vm363_vm0, %v332_v15, 0.0  ;;  %v333_v28 = vcombine.high %v301_v16, %v301_v16  ;;  %v311_v29 = vld [vmem:[%s3628_s19 + $0x60] sm:$0x77]  ;;  %v312_v35 = vld [vmem:[%s3628_s19 + $0x68] sm:$0x77] }
  0x3f   : > { %v366_v23 = vadd.f32 %v365_v18, %v364_v10  ;;  %v411_v30 = vadd.f32 %v410_v24, %v409_v14  ;;  %v371_v31 = vadd.f32 %v370_v25, %v369_v19  ;;  %v415_v32 = vsel %vm363_vm0, %v341_v20, 0.0  ;;  %v303_v34 = vld [vmem:[%s3628_s19 + $0x20] sm:$0x77]  ;;  %v304_v39 = vld [vmem:[%s3628_s19 + $0x28] sm:$0x77]  ;;  %p4011_p9 = scmp.ne.s32.totalorder %s4004_s11, 0 }
  0x40   : > { %407 = vadd.xlane.f32.xlu1 %v406_v22  ;;  %v342_v33 = vcombine.high %v310_v21, %v310_v21  ;;  %v374_v36 = vsel %vm363_vm0, %v301_v16, 0.0  ;;  %v375_v37 = vsel %vm363_vm0, %v333_v28, 0.0  ;;  %v334_v38 = vcombine.high %v302_v26, %v302_v26  ;;  %v313_v40 = vld [vmem:[%s3628_s19 + $0x70] sm:$0x77]  ;;  %v314_v47 = vld [vmem:[%s3628_s19 + $0x78] sm:$0x77] }
  0x41   : > { %367 = vadd.xlane.f32.xlu0 %v366_v23  ;;  %v343_v41 = vcombine.high %v311_v29, %v311_v29  ;;  %v305_v42 = vld [vmem:[%s3628_s19 + $0x30] sm:$0x77]  ;;  %v416_v43 = vadd.f32 %v415_v32, %v414_v27  ;;  %v419_v44 = vsel %vm363_vm0, %v310_v21, 0.0  ;;  %v335_v46 = vcombine.high %v303_v34, %v303_v34  ;;  %v306_v10 = vld [vmem:[%s3628_s19 + $0x38] sm:$0x77]  ;;  %v477_v25 = vld [vmem:[%s3994_s1] sm:$0xff] }
  0x42   : > { %v420_v45 = vsel %vm363_vm0, %v342_v33, 0.0  ;;  %v376_v48 = vadd.f32 %v375_v37, %v374_v36  ;;  %v379_v49 = vsel %vm363_vm0, %v302_v26, 0.0  ;;  %v380_v50 = vsel %vm363_vm0, %v334_v38, 0.0  ;;  %v478_v38 = vld [vmem:[%s3994_s1 + $0x8] sm:$0xff]  ;;  %s3493_s28 = smov [#allocation5]  }
  0x43   : > { %v344_v51 = vcombine.high %v312_v35, %v312_v35  ;;  %v424_v52 = vsel %vm363_vm0, %v311_v29, 0.0  ;;  %v336_v53 = vcombine.high %v304_v39, %v304_v39  ;;  %v421_v54 = vadd.f32 %v420_v45, %v419_v44  ;;  %s3420_s13 = sshll.u32 %s3493_s28, 4  ;;  %s3421_s13 = int_to_ptr.vmem [resolvable:$false] %s3420_s13 }
  0x44   : > { %412 = vadd.xlane.f32.xlu1 %v411_v30  ;;  %v425_v55 = vsel %vm363_vm0, %v343_v41, 0.0  ;;  %v345_v56 = vcombine.high %v313_v40, %v313_v40  ;;  %v337_v57 = vcombine.high %v305_v42, %v305_v42  ;;  %v381_v58 = vadd.f32 %v380_v50, %v379_v49  ;;  %v479_v49 = vld [vmem:[%s3994_s1 + $0x10] sm:$0xff]  ;;  %s3422_s16 = scalar_lea.vmem %s3421_s13, 512 }
  0x45   : > { %372 = vadd.xlane.f32.xlu0 %v371_v31  ;;  %v384_v59 = vsel %vm363_vm0, %v303_v34, 0.0  ;;  %v385_v60 = vsel %vm363_vm0, %v335_v46, 0.0  ;;  %v346_v61 = vcombine.high %v314_v47, %v314_v47  ;;  %v429_v62 = vsel %vm363_vm0, %v312_v35, 0.0 }
  0x46   : > { %v430_v63 = vsel %vm363_vm0, %v344_v51, 0.0  ;;  %v389_v0 = vsel %vm363_vm0, %v304_v39, 0.0  ;;  %v434_v1 = vsel %vm363_vm0, %v313_v40, 0.0  ;;  %v390_v4 = vsel %vm363_vm0, %v336_v53, 0.0 }
  0x47   : > { %v394_v5 = vsel %vm363_vm0, %v305_v42, 0.0  ;;  %v435_v6 = vsel %vm363_vm0, %v345_v56, 0.0  ;;  %v395_v7 = vsel %vm363_vm0, %v337_v57, 0.0  ;;  %v439_v8 = vsel %vm363_vm0, %v314_v47, 0.0 }
  0x48   : > { %417 = vadd.xlane.f32.xlu1 %v416_v43  ;;  %v440_v9 = vsel %vm363_vm0, %v346_v61, 0.0  ;;  %v426_v11 = vadd.f32 %v425_v55, %v424_v52  ;;  %v386_v12 = vadd.f32 %v385_v60, %v384_v59  ;;  %v431_v13 = vadd.f32 %v430_v63, %v429_v62  ;;  %v480_v59 = vld [vmem:[%s3994_s1 + $0x18] sm:$0xff] }
  0x49   : > { %377 = vadd.xlane.f32.xlu0 %v376_v48  ;;  %v391_v14 = vadd.f32 %v390_v4, %v389_v0  ;;  %v338_v15 = vcombine.high %v306_v10, %v306_v10  ;;  %v436_v16 = vadd.f32 %v435_v6, %v434_v1  ;;  %v396_v17 = vadd.f32 %v395_v7, %v394_v5 }
  0x4a   : > { %v399_v18 = vsel %vm363_vm0, %v306_v10, 0.0  ;;  %v441_v20 = vadd.f32 %v440_v9, %v439_v8  ;;  %v3487_v22 = vmov 1983009808   ;;  %v605_v27 = vcombine.high %v477_v25, %v477_v25 }
  0x4b   : > { %v400_v19 = vsel %vm363_vm0, %v338_v15, 0.0  ;;  %v607_v23 = vunpack.c.l.s4 %v3487_v22  ;;  %v3488_v31 = vmov 65535   ;;  %v622_v39 = vcombine.high %v478_v38, %v478_v38 }
  0x4c   : > { %422 = vadd.xlane.f32.xlu1 %v421_v54  ;;  %v401_v21 = vadd.f32 %v400_v19, %v399_v18  ;;  %v679_v32 = vsel %vm677_vm1, 4294967295, %v3488_v31  ;;  %v3489_v40 = vmov 0   ;;  %v639_v50 = vcombine.high %v479_v49, %v479_v49 }
  0x4d   : > { %382 = vadd.xlane.f32.xlu0 %v381_v58  ;;  %v608_v24 = vunpack.c.0.s8 %v607_v23  ;;  %v3683_v34 = vsel %vm678_vm2, %v679_v32, 0  ;;  %761 = vmatprep.mubr.bf16.mxu0 %v3489_v40  ;;  %v656_v60 = vcombine.high %v480_v59, %v480_v59 }
  0x4e   : > { %804 = vmatprep.mubr.bf16.mxu1 %v3489_v40 }
  0x4f   : > { %v611_v26 = vsub.s32 %v608_v24, %v3620_v2 }
  0x50   : > { %427 = vadd.xlane.f32.xlu1 %v426_v11 }
  0x51   : > { %387 = vadd.xlane.f32.xlu0 %v386_v12  ;;  %v612_v28 = vrot.slane %v477_v25, %v611_v26  ;;  %v619_v29 = vrot.slane %v605_v27, %v611_v26  ;;  %v3694_v41 = vrot.slane %v478_v38, %v611_v26  ;;  %v3696_v42 = vrot.slane %v622_v39, %v611_v26 }
  0x52   : > { %v3711_v51 = vrot.slane %v479_v49, %v611_v26  ;;  %v3713_v52 = vrot.slane %v639_v50, %v611_v26  ;;  %v3732_v61 = vrot.slane %v480_v59, %v611_v26  ;;  %v3734_v62 = vrot.slane %v656_v60, %v611_v26 }
  0x53   : > { %v620_v30 = vcombine.high %v612_v28, %v612_v28  ;;  %v621_v33 = vcombine.high %v619_v29, %v619_v29  ;;  %v682_v37 = vand.u32 %v3683_v34, %v612_v28  ;;  %v688_v2 = vand.u32 %v3683_v34, %v619_v29 }
  0x54   : > { %432 = vadd.xlane.f32.xlu1 %v431_v13  ;;  %v637_v43 = vcombine.high %v3694_v41, %v3694_v41  ;;  %v638_v44 = vcombine.high %v3696_v42, %v3696_v42  ;;  %v694_v45 = vand.u32 %v3683_v34, %v3694_v41  ;;  %v700_v46 = vand.u32 %v3683_v34, %v3696_v42  ;;  %v3245_v41 = vld [vmem:[#allocation2 + $0xc0] sm:$0xff]  }
  0x55   : > { %392 = vadd.xlane.f32.xlu0 %v391_v14  ;;  %v685_v35 = vand.u32 %v3683_v34, %v620_v30  ;;  %v691_v36 = vand.u32 %v3683_v34, %v621_v33  ;;  %v654_v53 = vcombine.high %v3711_v51, %v3711_v51  ;;  %v655_v54 = vcombine.high %v3713_v52, %v3713_v52  ;;  %v3246_v42 = vld [vmem:[#allocation2] sm:$0xff]  }
  0x56   : > { %v697_v47 = vand.u32 %v3683_v34, %v637_v43  ;;  %v703_v48 = vand.u32 %v3683_v34, %v638_v44  ;;  %v706_v55 = vand.u32 %v3683_v34, %v3711_v51  ;;  %v712_v56 = vand.u32 %v3683_v34, %v3713_v52  ;;  %v3249_v51 = vld [vmem:[#allocation2 + $0xc8] sm:$0xff]  }
  0x57   : > { %729 = vmatprep.subr.bf16.mxu0 %v685_v35  ;;  %772 = vmatprep.subr.bf16.mxu1 %v691_v36  ;;  %v3724_v57 = vand.u32 %v3683_v34, %v654_v53  ;;  %v3727_v58 = vand.u32 %v3683_v34, %v655_v54  ;;  %v671_v63 = vcombine.high %v3732_v61, %v3732_v61  ;;  %v3250_v52 = vld [vmem:[#allocation2 + $0x8] sm:$0xff]  }
  0x58   : > { %437 = vadd.xlane.f32.xlu1 %v436_v16  ;;  %730 = vmatpush1.bf16.msra.mxu0 %v682_v37  ;;  %v672_v0 = vcombine.high %v3734_v62, %v3734_v62  ;;  %v718_v1 = vand.u32 %v3683_v34, %v3732_v61  ;;  %v724_v4 = vand.u32 %v3683_v34, %v3734_v62  ;;  %v3257_v61 = vld [vmem:[#allocation2 + $0xd8] sm:$0xff]  }
  0x59   : > { %397 = vadd.xlane.f32.xlu0 %v396_v17  ;;  %773 = vmatpush1.bf16.msra.mxu1 %v688_v2  ;;  %v3745_v5 = vand.u32 %v3683_v34, %v671_v63  ;;  %v3258_v62 = vld [vmem:[#allocation2 + $0x18] sm:$0xff]  }
  0x5a   : > { %815 = vmatprep.subr.bf16.mxu0 %v697_v47  ;;  %858 = vmatprep.subr.bf16.mxu1 %v703_v48  ;;  %v3748_v6 = vand.u32 %v3683_v34, %v672_v0  ;;  %v3252_v34 = vld [vmem:[#allocation2 + $0x50] sm:$0xff]  }
  0x5c   : > { %442 = vadd.xlane.f32.xlu1 %v441_v20 }
  0x5d   : > { %402 = vadd.xlane.f32.xlu0 %v401_v21 }
  0xcd   : > { %v408_v7 = vpop.xlane.xlu1 %407 }
  0xce   : > { %v368_v8 = vpop.xlane.xlu0 %367  ;;  %v453_v15 = vmul.f32 0.00390625, %v408_v7 }
  0xcf   : > { %v445_v16 = vmul.f32 0.00390625, %v368_v8 }
  0xd0   : > { %v469_v21 = vpack.c.bf16 %v453_v15, %v453_v15 }
  0xd1   : > { %v413_v9 = vpop.xlane.xlu1 %412  ;;  %v461_v22 = vpack.c.bf16 %v445_v16, %v445_v16 }
  0xd2   : > { %v373_v10 = vpop.xlane.xlu0 %372  ;;  %v454_v13 = vmul.f32 0.00390625, %v413_v9  ;;  %v505_v33 = vunpack.c.l.b16 %v469_v21 }
  0xd3   : > { %v446_v14 = vmul.f32 0.00390625, %v373_v10  ;;  %v497_v35 = vunpack.c.l.b16 %v461_v22 }
  0xd4   : > { %v470_v19 = vpack.c.bf16 %v454_v13, %v454_v13  ;;  %v550_v8 = vrot.slane %v505_v33, %v3623_v3 }
  0xd5   : > { %v418_v11 = vpop.xlane.xlu1 %417  ;;  %v462_v20 = vpack.c.bf16 %v446_v14, %v446_v14  ;;  %v518_v9 = vrot.slane %v497_v35, %v3623_v3 }
  0xd6   : > { %v378_v12 = vpop.xlane.xlu0 %377  ;;  %v455_v23 = vmul.f32 0.00390625, %v418_v11  ;;  %v506_v31 = vunpack.c.l.b16 %v470_v19 }
  0xd7   : > { %v447_v24 = vmul.f32 0.00390625, %v378_v12  ;;  %v498_v32 = vunpack.c.l.b16 %v462_v20 }
  0xd8   : > { %v471_v36 = vpack.c.bf16 %v455_v23, %v455_v23  ;;  %v554_v50 = vrot.slane %v506_v31, %v3623_v3 }
  0xd9   : > { %v423_v17 = vpop.xlane.xlu1 %422  ;;  %v463_v37 = vpack.c.bf16 %v447_v24, %v447_v24  ;;  %v522_v53 = vrot.slane %v498_v32, %v3623_v3 }
  0xda   : > { %v383_v18 = vpop.xlane.xlu0 %382  ;;  %v456_v27 = vmul.f32 0.00390625, %v423_v17  ;;  %v507_v60 = vunpack.c.l.b16 %v471_v36  ;;  %v593_v16 = vsel %vm579_vm3, %v554_v50, %v550_v8 }
  0xdb   : > { %v448_v28 = vmul.f32 0.00390625, %v383_v18  ;;  %v499_v63 = vunpack.c.l.b16 %v463_v37  ;;  %v580_v17 = vsel %vm579_vm3, %v522_v53, %v518_v9 }
  0xdc   : > { %v472_v39 = vpack.c.bf16 %v456_v27, %v456_v27  ;;  %v558_v20 = vrot.slane %v507_v60, %v3623_v3 }
  0xdd   : > { %v428_v25 = vpop.xlane.xlu1 %427  ;;  %v464_v43 = vpack.c.bf16 %v448_v28, %v448_v28  ;;  %v526_v21 = vrot.slane %v499_v63, %v3623_v3 }
  0xde   : > { %v388_v26 = vpop.xlane.xlu0 %387  ;;  %v457_v29 = vmul.f32 0.00390625, %v428_v25  ;;  %v508_v10 = vunpack.c.l.b16 %v472_v39 }
  0xdf   : > { %v449_v30 = vmul.f32 0.00390625, %v388_v26  ;;  %v500_v11 = vunpack.c.l.b16 %v464_v43  ;;  %v582_v39 = vsel %vm581_vm4, %v526_v21, %v580_v17  ;;  %v3268_v17 = vld [vmem:[#allocation2 + $0x70] sm:$0xff]   ;;  %v3272_v21 = vld [vmem:[#allocation2 + $0x78] sm:$0xff]  }
  0xe0   : > { %v473_v48 = vpack.c.bf16 %v457_v29, %v457_v29  ;;  %v562_v26 = vrot.slane %v508_v10, %v3623_v3 }
  0xe1   : > { %v433_v2 = vpop.xlane.xlu1 %432  ;;  %v465_v49 = vpack.c.bf16 %v449_v30, %v449_v30  ;;  %v530_v27 = vrot.slane %v500_v11, %v3623_v3 }
  0xe2   : > { %v393_v38 = vpop.xlane.xlu0 %392  ;;  %v458_v44 = vmul.f32 0.00390625, %v433_v2  ;;  %v509_v12 = vunpack.c.l.b16 %v473_v48 }
  0xe3   : > { %v450_v47 = vmul.f32 0.00390625, %v393_v38  ;;  %v501_v13 = vunpack.c.l.b16 %v465_v49  ;;  %v594_v38 = vsel %vm581_vm4, %v558_v20, %v593_v16  ;;  %v584_v48 = vsel %vm583_vm5, %v530_v27, %v582_v39  ;;  %v3267_v16 = vld [vmem:[#allocation2 + $0xa8] sm:$0xff]   ;;  %v3271_v20 = vld [vmem:[#allocation2 + $0xb0] sm:$0xff]   ;;  %v3278_v39 = vld [vmem:[#allocation2 + $0x100] sm:$0xff]  }
  0xe4   : > { %v474_v54 = vpack.c.bf16 %v458_v44, %v458_v44  ;;  %v566_v30 = vrot.slane %v509_v12, %v3623_v3  ;;  %v3263_v12 = vld [vmem:[#allocation2 + $0xa0] sm:$0xff]  }
  0xe5   : > { %v466_v59 = vpack.c.bf16 %v450_v47, %v450_v47  ;;  %v438_v0 = vpop.xlane.xlu1 %437  ;;  %v534_v31 = vrot.slane %v501_v13, %v3623_v3  ;;  %v595_v47 = vsel %vm583_vm5, %v562_v26, %v594_v38  ;;  %v3264_v13 = vld [vmem:[#allocation2 + $0x68] sm:$0xff]   ;;  %v3277_v26 = vld [vmem:[#allocation2 + $0x1c0] sm:$0xff]  }
  0xe6   : > { %v398_v7 = vpop.xlane.xlu0 %397  ;;  %v459_v14 = vmul.f32 0.00390625, %v438_v0  ;;  %v510_v18 = vunpack.c.l.b16 %v474_v54  ;;  %v596_v53 = vsel %vm585_vm6, %v566_v30, %v595_v47  ;;  %v3281_v47 = vld [vmem:[#allocation2 + $0x1c8] sm:$0xff]  }
  0xe7   : > { %v451_v15 = vmul.f32 0.00390625, %v398_v7  ;;  %v502_v19 = vunpack.c.l.b16 %v466_v59  ;;  %v586_v54 = vsel %vm585_vm6, %v534_v31, %v584_v48 }
  0xe8   : > { %v475_v22 = vpack.c.bf16 %v459_v14, %v459_v14  ;;  %v570_v35 = vrot.slane %v510_v18, %v3623_v3  ;;  %v3265_v14 = vld [vmem:[#allocation2 + $0xe8] sm:$0xff]   ;;  %v3269_v18 = vld [vmem:[#allocation2 + $0xf0] sm:$0xff]  }
  0xe9   : > { %v467_v23 = vpack.c.bf16 %v451_v15, %v451_v15  ;;  %v443_v24 = vpop.xlane.xlu1 %442  ;;  %v538_v36 = vrot.slane %v502_v19, %v3623_v3  ;;  %v3266_v15 = vld [vmem:[#allocation2 + $0x28] sm:$0xff]   ;;  %v3270_v19 = vld [vmem:[#allocation2 + $0x30] sm:$0xff]  }
  0xea   : > { %v403_v25 = vpop.xlane.xlu0 %402  ;;  %v460_v28 = vmul.f32 0.00390625, %v443_v24  ;;  %v511_v32 = vunpack.c.l.b16 %v475_v22  ;;  %v597_v59 = vsel %vm587_vm7, %v570_v35, %v596_v53  ;;  %v3273_v22 = vld [vmem:[#allocation2 + $0xf8] sm:$0xff]   ;;  %v3283_v53 = vld [vmem:[#allocation2 + $0x188] sm:$0xff]  }
  0xeb   : > { %v452_v29 = vmul.f32 0.00390625, %v403_v25  ;;  %v503_v33 = vunpack.c.l.b16 %v467_v23  ;;  %v588_v60 = vsel %vm587_vm7, %v538_v36, %v586_v54  ;;  %v3274_v23 = vld [vmem:[#allocation2 + $0x38] sm:$0xff]   ;;  %v3276_v25 = vld [vmem:[#allocation2 + $0x140] sm:$0xff]  }
  0xec   : > { %v476_v37 = vpack.c.bf16 %v460_v28, %v460_v28  ;;  %v574_v43 = vrot.slane %v511_v32, %v3623_v3  ;;  %v3275_v24 = vld [vmem:[#allocation2 + $0xb8] sm:$0xff]  }
  0xed   : > { %v468_v2 = vpack.c.bf16 %v452_v29, %v452_v29  ;;  %v542_v44 = vrot.slane %v503_v33, %v3623_v3 }
  0xee   : > { %v512_v49 = vunpack.c.l.b16 %v476_v37  ;;  %v598_v7 = vsel %vm589_vm8, %v574_v43, %v597_v59  ;;  %v3279_v43 = vld [vmem:[#allocation2 + $0x180] sm:$0xff]  }
  0xef   : > { %v504_v50 = vunpack.c.l.b16 %v468_v2  ;;  %v590_v8 = vsel %vm589_vm8, %v542_v44, %v588_v60  ;;  %v3280_v44 = vld [vmem:[#allocation2 + $0x148] sm:$0xff]   ;;  %v3284_v60 = vld [vmem:[#allocation2 + $0x150] sm:$0xff]  }
  0xf0   : > { %v578_v63 = vrot.slane %v512_v49, %v3623_v3 }
  0xf1   : > { %v546_v0 = vrot.slane %v504_v50, %v3623_v3  ;;  %v3244_v3 = vld [vmem:[#allocation2 + $0x40] sm:$0xff]   ;;  %v3282_v50 = vld [vmem:[#allocation2 + $0x108] sm:$0xff]  }
  0xf2   : > { %v599_v9 = vsel %vm591_vm9, %v578_v63, %v598_v7  ;;  %v3285_v63 = vld [vmem:[#allocation2 + $0x1d0] sm:$0xff]  }
  0xf3   : > { %v592_v10 = vsel %vm591_vm9, %v546_v0, %v590_v8 }
  0xf4   : > { %v600_v11 = vpack.c.b16 %v599_v9, %v592_v10 }
  0xf6   : > { %2791 = vmatmul.mubr.msk.bf16.vlgmr.msra.gmra.mrb[0].mxu0 %vm673_vm10, %v600_v11  ;;  %2792 = vmatmul.mubr.msk.bf16.vlgmr.msra.gmra.mrb[0].mxu1 %vm673_vm10, %v600_v11 }
  0xf7   : > { %816 = vmatpush1.bf16.msra.mxu0 %v694_v45  ;;  %859 = vmatpush1.bf16.msra.mxu1 %v700_v46  ;;  %v3247_v45 = vld [vmem:[#allocation2 + $0x80] sm:$0xff]   ;;  %v3248_v46 = vld [vmem:[#allocation2 + $0x48] sm:$0xff]  }
  0xf8   : > { %847 = vmatprep.mubr.bf16.mxu0 %v3489_v40  ;;  %890 = vmatprep.mubr.bf16.mxu1 %v3489_v40 }
  0xf9   : > { %901 = vmatprep.subr.bf16.mxu0 %v3724_v57  ;;  %944 = vmatprep.subr.bf16.mxu1 %v3727_v58  ;;  %v3255_v57 = vld [vmem:[#allocation2 + $0x90] sm:$0xff]   ;;  %v3256_v58 = vld [vmem:[#allocation2 + $0x58] sm:$0xff]  }
  0xfe   : > { %2793 = vmatmul.mubr.msk.bf16.vlgmr.msra.gmra.mrb[4].mxu0 %vm673_vm10, %v600_v11  ;;  %2794 = vmatmul.mubr.msk.bf16.vlgmr.msra.gmra.mrb[4].mxu1 %vm673_vm10, %v600_v11 }
  0xff   : > { %902 = vmatpush1.bf16.msra.mxu0 %v706_v55  ;;  %945 = vmatpush1.bf16.msra.mxu1 %v712_v56  ;;  %v3251_v55 = vld [vmem:[#allocation2 + $0x88] sm:$0xff]   ;;  %v3253_v56 = vld [vmem:[#allocation2 + $0xd0] sm:$0xff]  }
 0x100   : > { %933 = vmatprep.mubr.bf16.mxu0 %v3489_v40  ;;  %976 = vmatprep.mubr.bf16.mxu1 %v3489_v40 }
 0x101   : > { %987 = vmatprep.subr.bf16.mxu0 %v3745_v5  ;;  %1030 = vmatprep.subr.bf16.mxu1 %v3748_v6  ;;  %v3261_v5 = vld [vmem:[#allocation2 + $0xe0] sm:$0xff]  }
 0x102   : > { %v3262_v6 = vld [vmem:[#allocation2 + $0x20] sm:$0xff]  }
 0x106   : > { %2795 = vmatmul.mubr.msk.bf16.vlgmr.msra.gmra.mrb[8].mxu0 %vm673_vm10, %v600_v11  ;;  %2796 = vmatmul.mubr.msk.bf16.vlgmr.msra.gmra.mrb[8].mxu1 %vm673_vm10, %v600_v11 }
 0x107   : > { %988 = vmatpush1.bf16.msra.mxu0 %v718_v1  ;;  %1031 = vmatpush1.bf16.msra.mxu1 %v724_v4  ;;  %v3259_v1 = vld [vmem:[#allocation2 + $0x98] sm:$0xff]   ;;  %v3260_v4 = vld [vmem:[#allocation2 + $0x60] sm:$0xff]  }
 0x108   : > { %1019 = vmatprep.mubr.bf16.mxu0 %v3489_v40  ;;  %1062 = vmatprep.mubr.bf16.mxu1 %v3489_v40  ;;  %v3254_v40 = vld [vmem:[#allocation2 + $0x10] sm:$0xff]  }
 0x109   : > { %2946 = vmatprep.subr.bf16.mxu0 %v3244_v3  ;;  %2968 = vmatprep.subr.bf16.mxu1 %v3245_v41 }
 0x10e   : > { %2797 = vmatmul.mubr.msk.bf16.vlgmr.msra.gmra.mrb[12].mxu0 %vm673_vm10, %v600_v11  ;;  %2798 = vmatmul.mubr.msk.bf16.vlgmr.msra.gmra.mrb[12].mxu1 %vm673_vm10, %v600_v11 }
 0x10f   : > { %2947 = vmatpush3.bf16.msra.mxu0 %v3246_v42  ;;  %2969 = vmatpush3.bf16.msra.mxu1 %v3247_v45  ;;  %v3286_v42 = vld [vmem:[#allocation2 + $0x110] sm:$0xff]  }
 0x110   : > { %2948 = vmatprep.subr.bf16.mxu0 %v3248_v46  ;;  %2970 = vmatprep.subr.bf16.mxu1 %v3249_v51  ;;  %v3287_v45 = vld [vmem:[#allocation2 + $0x190] sm:$0xff]   ;;  %v3288_v46 = vld [vmem:[#allocation2 + $0x158] sm:$0xff]  }
 0x111   : > { %v3289_v51 = vld [vmem:[#allocation2 + $0x1d8] sm:$0xff]  }
 0x113   : > { %2949 = vmatpush3.bf16.msra.mxu0 %v3250_v52  ;;  %2971 = vmatpush3.bf16.msra.mxu1 %v3251_v55 }
 0x114   : > { %2950 = vmatprep.subr.bf16.mxu0 %v3252_v34  ;;  %2972 = vmatprep.subr.bf16.mxu1 %v3253_v56  ;;  %v3290_v34 = vld [vmem:[#allocation2 + $0x118] sm:$0xff]  }
 0x115   : > { %v3291_v56 = vld [vmem:[#allocation2 + $0x198] sm:$0xff]  }
 0x117   : > { %2951 = vmatpush3.bf16.msra.mxu0 %v3254_v40  ;;  %2973 = vmatpush3.bf16.msra.mxu1 %v3255_v57 }
 0x118   : > { %2952 = vmatprep.subr.bf16.mxu0 %v3256_v58  ;;  %2974 = vmatprep.subr.bf16.mxu1 %v3257_v61  ;;  %v3292_v58 = vld [vmem:[#allocation2 + $0x160] sm:$0xff]  }
 0x119   : > { %v3293_v61 = vld [vmem:[#allocation2 + $0x1e0] sm:$0xff]  }
 0x11b   : > { %2953 = vmatpush3.bf16.msra.mxu0 %v3258_v62  ;;  %2975 = vmatpush3.bf16.msra.mxu1 %v3259_v1 }
 0x11c   : > { %2954 = vmatprep.subr.bf16.mxu0 %v3260_v4  ;;  %2976 = vmatprep.subr.bf16.mxu1 %v3261_v5 }
 0x11f   : > { %2955 = vmatpush3.bf16.msra.mxu0 %v3262_v6  ;;  %2977 = vmatpush3.bf16.msra.mxu1 %v3263_v12 }
 0x120   : > { %2956 = vmatprep.subr.bf16.mxu0 %v3264_v13  ;;  %2978 = vmatprep.subr.bf16.mxu1 %v3265_v14 }
 0x123   : > { %2957 = vmatpush3.bf16.msra.mxu0 %v3266_v15  ;;  %2979 = vmatpush3.bf16.msra.mxu1 %v3267_v16  ;;  %v3294_v15 = vld [vmem:[#allocation2 + $0x120] sm:$0xff]  }
 0x124   : > { %2958 = vmatprep.subr.bf16.mxu0 %v3268_v17  ;;  %2980 = vmatprep.subr.bf16.mxu1 %v3269_v18  ;;  %v3295_v16 = vld [vmem:[#allocation2 + $0x1a0] sm:$0xff]   ;;  %v3296_v17 = vld [vmem:[#allocation2 + $0x168] sm:$0xff]  }
 0x125   : > { %v3297_v18 = vld [vmem:[#allocation2 + $0x1e8] sm:$0xff]  }
 0x127   : > { %2959 = vmatpush3.bf16.msra.mxu0 %v3270_v19  ;;  %2981 = vmatpush3.bf16.msra.mxu1 %v3271_v20 }
 0x128   : > { %2960 = vmatprep.subr.bf16.mxu0 %v3272_v21  ;;  %2982 = vmatprep.subr.bf16.mxu1 %v3273_v22  ;;  %v3298_v21 = vld [vmem:[#allocation2 + $0x128] sm:$0xff]  }
 0x129   : > { %v3299_v22 = vld [vmem:[#allocation2 + $0x1a8] sm:$0xff]  }
 0x12b   : > { %2961 = vmatpush3.bf16.msra.mxu0 %v3274_v23  ;;  %2983 = vmatpush3.bf16.msra.mxu1 %v3275_v24 }
 0x12c   : > { %2990 = vmatprep.subr.bf16.mxu0 %v3276_v25  ;;  %3012 = vmatprep.subr.bf16.mxu1 %v3277_v26  ;;  %v3300_v25 = vld [vmem:[#allocation2 + $0x170] sm:$0xff]  }
 0x12d   : > { %v3301_v26 = vld [vmem:[#allocation2 + $0x1f0] sm:$0xff]  }
 0x1c9   : > { %v763_v27 = vpop.f32.mrb[0].mxu0  ;;  %v806_v28 = vpop.f32.mrb[0].mxu1 }
 0x1ca   : > { %v765_v29 = vpop.f32.mrb[1].mxu0  ;;  %v808_v30 = vpop.f32.mrb[1].mxu1 }
 0x1cb   : > { %v767_v31 = vpop.f32.mrb[2].mxu0  ;;  %v810_v32 = vpop.f32.mrb[2].mxu1 }
 0x1cc   : > { %v1073_v33 = vpack.c.bf16 %v767_v31, %v763_v27  ;;  %v1075_v35 = vpack.c.bf16 %v810_v32, %v806_v28  ;;  %v769_v36 = vpop.f32.mrb[3].mxu0  ;;  %v812_v37 = vpop.f32.mrb[3].mxu1 }
 0x1cd   : > { %v1074_v2 = vpack.c.bf16 %v769_v36, %v765_v29  ;;  %v1076_v38 = vpack.c.bf16 %v812_v37, %v808_v30  ;;  %v3302_v36 = vld [vmem:[#allocation2 + $0x130] sm:$0xff]  }
 0x1ce   : > { %v3303_v37 = vld [vmem:[#allocation2 + $0x1b0] sm:$0xff]  }
 0x1cf   : > { %2152 = vmatprep.mubr.bf16.mxu0 %v1074_v2  ;;  %2193 = vmatprep.mubr.bf16.mxu1 %v1076_v38  ;;  %v3304_v2 = vld [vmem:[#allocation2 + $0x178] sm:$0xff]  }
 0x1d0   : > { %2153 = vmatmul.mubr.bf16.vlgmr.msra.gmra.mrb[16].mxu0 %v1073_v33  ;;  %2194 = vmatmul.mubr.bf16.vlgmr.msra.gmra.mrb[16].mxu1 %v1075_v35  ;;  %v3305_v38 = vld [vmem:[#allocation2 + $0x1f8] sm:$0xff]  }
 0x1d1   : > { %2991 = vmatpush3.bf16.msra.mxu0 %v3278_v39  ;;  %3013 = vmatpush3.bf16.msra.mxu1 %v3279_v43  ;;  %v3814_v48 = vpop.f32.mrb[4].mxu0  ;;  %v3816_v49 = vpop.f32.mrb[4].mxu1  ;;  %v3306_v39 = vld [vmem:[#allocation2 + $0x138] sm:$0xff]  }
 0x1d2   : > { %v851_v54 = vpop.f32.mrb[5].mxu0  ;;  %v894_v59 = vpop.f32.mrb[5].mxu1  ;;  %2992 = vmatprep.subr.bf16.mxu0 %v3280_v44  ;;  %3014 = vmatprep.subr.bf16.mxu1 %v3281_v47  ;;  %v3307_v43 = vld [vmem:[#allocation2 + $0x1b8] sm:$0xff]   ;;  %v3308_v44 = vld [vmem:[#allocation2 + $0x240] sm:$0xff]  }
 0x1d3   : > { %v3818_v0 = vpop.f32.mrb[6].mxu0  ;;  %v3820_v7 = vpop.f32.mrb[6].mxu1  ;;  %v3309_v47 = vld [vmem:[#allocation2 + $0x2c0] sm:$0xff]  }
 0x1d4   : > { %v1077_v8 = vpack.c.bf16 %v3818_v0, %v3814_v48  ;;  %v1079_v9 = vpack.c.bf16 %v3820_v7, %v3816_v49  ;;  %v855_v10 = vpop.f32.mrb[7].mxu0  ;;  %v898_v11 = vpop.f32.mrb[7].mxu1  ;;  %v3319_v48 = vld [vmem:[#allocation2 + $0x290] sm:$0xff]   ;;  %v3320_v0 = vld [vmem:[#allocation2 + $0x258] sm:$0xff]  }
 0x1d5   : > { %v1078_v3 = vpack.c.bf16 %v855_v10, %v851_v54  ;;  %v1080_v41 = vpack.c.bf16 %v898_v11, %v894_v59  ;;  %2993 = vmatpush3.bf16.msra.mxu0 %v3282_v50  ;;  %3015 = vmatpush3.bf16.msra.mxu1 %v3283_v53  ;;  %v3310_v50 = vld [vmem:[#allocation2 + $0x200] sm:$0xff]   ;;  %v3312_v54 = vld [vmem:[#allocation2 + $0x248] sm:$0xff]   ;;  %v3316_v10 = vld [vmem:[#allocation2 + $0x250] sm:$0xff]  }
 0x1d6   : > { %2994 = vmatprep.subr.bf16.mxu0 %v3284_v60  ;;  %3016 = vmatprep.subr.bf16.mxu1 %v3285_v63  ;;  %v3311_v53 = vld [vmem:[#allocation2 + $0x280] sm:$0xff]   ;;  %v3313_v59 = vld [vmem:[#allocation2 + $0x2c8] sm:$0xff]   ;;  %v3317_v11 = vld [vmem:[#allocation2 + $0x2d0] sm:$0xff]  }
 0x1d7   : > { %2234 = vmatprep.mubr.bf16.mxu0 %v1078_v3  ;;  %2275 = vmatprep.mubr.bf16.mxu1 %v1080_v41  ;;  %v3314_v60 = vld [vmem:[#allocation2 + $0x208] sm:$0xff]   ;;  %v3318_v3 = vld [vmem:[#allocation2 + $0x210] sm:$0xff]   ;;  %v3322_v49 = vld [vmem:[#allocation2 + $0x218] sm:$0xff]  }
 0x1d8   : > { %v3315_v63 = vld [vmem:[#allocation2 + $0x288] sm:$0xff]   ;;  %v3323_v7 = vld [vmem:[#allocation2 + $0x298] sm:$0xff]   ;;  %v3325_v41 = vld [vmem:[#allocation2 + $0x2e0] sm:$0xff]  }
 0x1d9   : > { %2995 = vmatpush3.bf16.msra.mxu0 %v3286_v42  ;;  %3017 = vmatpush3.bf16.msra.mxu1 %v3287_v45  ;;  %v3826_v52 = vpop.f32.mrb[8].mxu0  ;;  %v3828_v55 = vpop.f32.mrb[8].mxu1  ;;  %v3326_v42 = vld [vmem:[#allocation2 + $0x220] sm:$0xff]  }
 0x1da   : > { %v3830_v40 = vpop.f32.mrb[9].mxu0  ;;  %v3832_v57 = vpop.f32.mrb[9].mxu1  ;;  %2996 = vmatprep.subr.bf16.mxu0 %v3288_v46  ;;  %3018 = vmatprep.subr.bf16.mxu1 %v3289_v51  ;;  %v3327_v45 = vld [vmem:[#allocation2 + $0x2a0] sm:$0xff]   ;;  %v3328_v46 = vld [vmem:[#allocation2 + $0x268] sm:$0xff]  }
 0x1db   : > { %v3834_v62 = vpop.f32.mrb[10].mxu0  ;;  %v3836_v1 = vpop.f32.mrb[10].mxu1  ;;  %v3329_v51 = vld [vmem:[#allocation2 + $0x2e8] sm:$0xff]  }
 0x1dc   : > { %v1081_v4 = vpack.c.bf16 %v3834_v62, %v3826_v52  ;;  %v1083_v5 = vpack.c.bf16 %v3836_v1, %v3828_v55  ;;  %v941_v6 = vpop.f32.mrb[11].mxu0  ;;  %v984_v12 = vpop.f32.mrb[11].mxu1  ;;  %v3349_v52 = vld [vmem:[#allocation2 + $0x3d0] sm:$0xff]   ;;  %v3352_v1 = vld [vmem:[#allocation2 + $0x358] sm:$0xff]  }
 0x1dd   : > { %v1082_v13 = vpack.c.bf16 %v941_v6, %v3830_v40  ;;  %v1084_v14 = vpack.c.bf16 %v984_v12, %v3832_v57  ;;  %2997 = vmatpush3.bf16.msra.mxu0 %v3290_v34  ;;  %3019 = vmatpush3.bf16.msra.mxu1 %v3291_v56  ;;  %v3330_v34 = vld [vmem:[#allocation2 + $0x228] sm:$0xff]   ;;  %v3332_v40 = vld [vmem:[#allocation2 + $0x270] sm:$0xff]   ;;  %v3336_v6 = vld [vmem:[#allocation2 + $0x278] sm:$0xff]  }
 0x1de   : > { %2998 = vmatprep.subr.bf16.mxu0 %v3292_v58  ;;  %3020 = vmatprep.subr.bf16.mxu1 %v3293_v61  ;;  %v3331_v56 = vld [vmem:[#allocation2 + $0x2a8] sm:$0xff]   ;;  %v3333_v57 = vld [vmem:[#allocation2 + $0x2f0] sm:$0xff]   ;;  %v3337_v12 = vld [vmem:[#allocation2 + $0x2f8] sm:$0xff]  }
 0x1df   : > { %v3334_v58 = vld [vmem:[#allocation2 + $0x230] sm:$0xff]  }
 0x1e0   : > { %v3335_v61 = vld [vmem:[#allocation2 + $0x2b0] sm:$0xff]  }
 0x1e1   : > { %2999 = vmatpush3.bf16.msra.mxu0 %v3294_v15  ;;  %3021 = vmatpush3.bf16.msra.mxu1 %v3295_v16  ;;  %v3844_v19 = vpop.f32.mrb[12].mxu0  ;;  %v3846_v20 = vpop.f32.mrb[12].mxu1  ;;  %v3340_v15 = vld [vmem:[#allocation2 + $0x340] sm:$0xff]   ;;  %v3350_v62 = vld [vmem:[#allocation2 + $0x310] sm:$0xff]  }
 0x1e2   : > { %v3848_v23 = vpop.f32.mrb[13].mxu0  ;;  %v3850_v24 = vpop.f32.mrb[13].mxu1  ;;  %3000 = vmatprep.subr.bf16.mxu0 %v3296_v17  ;;  %3022 = vmatprep.subr.bf16.mxu1 %v3297_v18  ;;  %v3341_v16 = vld [vmem:[#allocation2 + $0x3c0] sm:$0xff]   ;;  %v3351_v55 = vld [vmem:[#allocation2 + $0x390] sm:$0xff]  }
 0x1e3   : > { %v3852_v27 = vpop.f32.mrb[14].mxu0  ;;  %v3854_v28 = vpop.f32.mrb[14].mxu1  ;;  %v3342_v17 = vld [vmem:[#allocation2 + $0x300] sm:$0xff]  }
 0x1e4   : > { %v1085_v29 = vpack.c.bf16 %v3852_v27, %v3844_v19  ;;  %v1087_v30 = vpack.c.bf16 %v3854_v28, %v3846_v20  ;;  %v3860_v31 = vpop.f32.mrb[15].mxu0  ;;  %v3862_v32 = vpop.f32.mrb[15].mxu1  ;;  %v3343_v18 = vld [vmem:[#allocation2 + $0x380] sm:$0xff]   ;;  %v3373_v19 = vld [vmem:[%s3997_s4 + $0x8] sm:$0xff]   ;;  %v3374_v20 = vld [vmem:[%s3997_s4 + $0x10] sm:$0xff]  }
 0x1e5   : > { %v1086_v33 = vpack.c.bf16 %v3860_v31, %v3848_v23  ;;  %v1088_v35 = vpack.c.bf16 %v3862_v32, %v3850_v24  ;;  %3001 = vmatpush3.bf16.msra.mxu0 %v3298_v21  ;;  %3023 = vmatpush3.bf16.msra.mxu1 %v3299_v22  ;;  %v3344_v21 = vld [vmem:[#allocation2 + $0x348] sm:$0xff]   ;;  %v3355_v23 = vld [vmem:[#allocation2 + $0x398] sm:$0xff]   ;;  %v3356_v31 = vld [vmem:[#allocation2 + $0x360] sm:$0xff]  }
 0x1e6   : > { %3002 = vmatprep.subr.bf16.mxu0 %v3300_v25  ;;  %3024 = vmatprep.subr.bf16.mxu1 %v3301_v26  ;;  %v3345_v22 = vld [vmem:[#allocation2 + $0x3c8] sm:$0xff]   ;;  %v3357_v24 = vld [vmem:[#allocation2 + $0x3e0] sm:$0xff]   ;;  %v3375_v27 = vld [vmem:[%s3997_s4 + $0x18] sm:$0xff]  }
 0x1e7   : > { %v3346_v25 = vld [vmem:[#allocation2 + $0x308] sm:$0xff]   ;;  %v3358_v32 = vld [vmem:[#allocation2 + $0x320] sm:$0xff]  }
 0x1e8   : > { %v3347_v26 = vld [vmem:[#allocation2 + $0x388] sm:$0xff]  }
 0x1e9   : > { %3003 = vmatpush3.bf16.msra.mxu0 %v3302_v36  ;;  %3025 = vmatpush3.bf16.msra.mxu1 %v3303_v37  ;;  %v3348_v36 = vld [vmem:[#allocation2 + $0x350] sm:$0xff]   ;;  %v3361_v37 = vld [vmem:[#allocation2 + $0x3e8] sm:$0xff]  }
 0x1ea   : > { %3004 = vmatprep.subr.bf16.mxu0 %v3304_v2  ;;  %3026 = vmatprep.subr.bf16.mxu1 %v3305_v38  ;;  %v3362_v2 = vld [vmem:[#allocation2 + $0x328] sm:$0xff]  }
 0x1eb   : > { %v3363_v38 = vld [vmem:[#allocation2 + $0x3a8] sm:$0xff]  }
 0x1ed   : > { %3005 = vmatpush3.bf16.msra.mxu0 %v3306_v39  ;;  %3027 = vmatpush3.bf16.msra.mxu1 %v3307_v43  ;;  %v3364_v39 = vld [vmem:[#allocation2 + $0x370] sm:$0xff]  }
 0x1ee   : > { %3034 = vmatprep.subr.bf16.mxu0 %v3308_v44  ;;  %3056 = vmatprep.subr.bf16.mxu1 %v3309_v47  ;;  %v3365_v43 = vld [vmem:[#allocation2 + $0x3f0] sm:$0xff]  }
 0x1ef   : > { %v3366_v44 = vld [vmem:[#allocation2 + $0x330] sm:$0xff]  }
 0x1f0   : > { %2235 = vmatmul.mubr.bf16.vlgmr.msra.gmra.mrb[20].mxu0 %v1077_v8  ;;  %2276 = vmatmul.mubr.bf16.vlgmr.msra.gmra.mrb[20].mxu1 %v1079_v9  ;;  %v3321_v8 = vld [vmem:[#allocation2 + $0x2d8] sm:$0xff]   ;;  %v3324_v9 = vld [vmem:[#allocation2 + $0x260] sm:$0xff]   ;;  %v3367_v47 = vld [vmem:[#allocation2 + $0x3b0] sm:$0xff]  }
 0x1f1   : > { %3035 = vmatpush3.bf16.msra.mxu0 %v3310_v50  ;;  %2316 = vmatprep.mubr.bf16.mxu0 %v1082_v13  ;;  %v3338_v13 = vld [vmem:[#allocation2 + $0x238] sm:$0xff]  }
 0x1f2   : > { %3057 = vmatpush3.bf16.msra.mxu1 %v3311_v53  ;;  %2357 = vmatprep.mubr.bf16.mxu1 %v1084_v14  ;;  %v3339_v14 = vld [vmem:[#allocation2 + $0x2b8] sm:$0xff]  }
 0x1f3   : > { %3036 = vmatprep.subr.bf16.mxu0 %v3312_v54  ;;  %3058 = vmatprep.subr.bf16.mxu1 %v3313_v59  ;;  %v3368_v50 = vld [vmem:[#allocation2 + $0x378] sm:$0xff]  }
 0x1f4   : > { %v3369_v53 = vld [vmem:[#allocation2 + $0x3f8] sm:$0xff]  }
 0x1f5   : > { %3037 = vmatpush3.bf16.msra.mxu0 %v3314_v60  ;;  %v3370_v54 = vld [vmem:[#allocation2 + $0x338] sm:$0xff]   ;;  %v3372_v60 = vld [vmem:[%s3997_s4] sm:$0xff]  }
 0x1f6   : > { %3059 = vmatpush3.bf16.msra.mxu1 %v3315_v63  ;;  %3038 = vmatprep.subr.bf16.mxu0 %v3316_v10  ;;  %v3371_v59 = vld [vmem:[#allocation2 + $0x3b8] sm:$0xff]   ;;  %v3490_v63 = vmov 0.0  }
 0x1f7   : > { %3060 = vmatprep.subr.bf16.mxu1 %v3317_v11 }
 0x1f9   : > { %3039 = vmatpush3.bf16.msra.mxu0 %v3318_v3 }
 0x1fa   : > { %3061 = vmatpush3.bf16.msra.mxu1 %v3319_v48  ;;  %3040 = vmatprep.subr.bf16.mxu0 %v3320_v0 }
 0x1fb   : > { %3062 = vmatprep.subr.bf16.mxu1 %v3321_v8 }
 0x1fd   : > { %3041 = vmatpush3.bf16.msra.mxu0 %v3322_v49 }
 0x1fe   : > { %3063 = vmatpush3.bf16.msra.mxu1 %v3323_v7  ;;  %3042 = vmatprep.subr.bf16.mxu0 %v3324_v9 }
 0x1ff   : > { %3064 = vmatprep.subr.bf16.mxu1 %v3325_v41 }
 0x201   : > { %3043 = vmatpush3.bf16.msra.mxu0 %v3326_v42 }
 0x202   : > { %3065 = vmatpush3.bf16.msra.mxu1 %v3327_v45  ;;  %3044 = vmatprep.subr.bf16.mxu0 %v3328_v46 }
 0x203   : > { %3066 = vmatprep.subr.bf16.mxu1 %v3329_v51 }
 0x205   : > { %3045 = vmatpush3.bf16.msra.mxu0 %v3330_v34 }
 0x206   : > { %3067 = vmatpush3.bf16.msra.mxu1 %v3331_v56  ;;  %3046 = vmatprep.subr.bf16.mxu0 %v3332_v40 }
 0x207   : > { %3068 = vmatprep.subr.bf16.mxu1 %v3333_v57 }
 0x209   : > { %3047 = vmatpush3.bf16.msra.mxu0 %v3334_v58 }
 0x20a   : > { %3069 = vmatpush3.bf16.msra.mxu1 %v3335_v61  ;;  %3048 = vmatprep.subr.bf16.mxu0 %v3336_v6 }
 0x20b   : > { %3070 = vmatprep.subr.bf16.mxu1 %v3337_v12 }
 0x20d   : > { %3049 = vmatpush3.bf16.msra.mxu0 %v3338_v13 }
 0x20e   : > { %3071 = vmatpush3.bf16.msra.mxu1 %v3339_v14  ;;  %3078 = vmatprep.subr.bf16.mxu0 %v3340_v15 }
 0x20f   : > { %3100 = vmatprep.subr.bf16.mxu1 %v3341_v16 }
 0x210   : > { %2317 = vmatmul.mubr.bf16.vlgmr.msra.gmra.mrb[24].mxu0 %v1081_v4  ;;  %v3353_v4 = vld [vmem:[#allocation2 + $0x3d8] sm:$0xff]  }
 0x211   : > { %2358 = vmatmul.mubr.bf16.vlgmr.msra.gmra.mrb[24].mxu1 %v1083_v5  ;;  %3079 = vmatpush3.bf16.msra.mxu0 %v3342_v17  ;;  %v3354_v5 = vld [vmem:[#allocation2 + $0x318] sm:$0xff]  }
 0x212   : > { %2398 = vmatprep.mubr.bf16.mxu0 %v1086_v33  ;;  %3101 = vmatpush3.bf16.msra.mxu1 %v3343_v18  ;;  %v3359_v33 = vld [vmem:[#allocation2 + $0x3a0] sm:$0xff]  }
 0x213   : > { %2439 = vmatprep.mubr.bf16.mxu1 %v1088_v35  ;;  %3080 = vmatprep.subr.bf16.mxu0 %v3344_v21  ;;  %v3360_v35 = vld [vmem:[#allocation2 + $0x368] sm:$0xff]  }
 0x214   : > { %3102 = vmatprep.subr.bf16.mxu1 %v3345_v22 }
 0x215   : > { %3081 = vmatpush3.bf16.msra.mxu0 %v3346_v25 }
 0x216   : > { %3103 = vmatpush3.bf16.msra.mxu1 %v3347_v26  ;;  %3082 = vmatprep.subr.bf16.mxu0 %v3348_v36 }
 0x217   : > { %3104 = vmatprep.subr.bf16.mxu1 %v3349_v52 }
 0x219   : > { %3083 = vmatpush3.bf16.msra.mxu0 %v3350_v62 }
 0x21a   : > { %3105 = vmatpush3.bf16.msra.mxu1 %v3351_v55  ;;  %3084 = vmatprep.subr.bf16.mxu0 %v3352_v1 }
 0x21b   : > { %3106 = vmatprep.subr.bf16.mxu1 %v3353_v4 }
 0x21d   : > { %3085 = vmatpush3.bf16.msra.mxu0 %v3354_v5 }
 0x21e   : > { %3107 = vmatpush3.bf16.msra.mxu1 %v3355_v23  ;;  %3086 = vmatprep.subr.bf16.mxu0 %v3356_v31 }
 0x21f   : > { %3108 = vmatprep.subr.bf16.mxu1 %v3357_v24 }
 0x221   : > { %3087 = vmatpush3.bf16.msra.mxu0 %v3358_v32 }
 0x222   : > { %3109 = vmatpush3.bf16.msra.mxu1 %v3359_v33  ;;  %3088 = vmatprep.subr.bf16.mxu0 %v3360_v35 }
 0x223   : > { %3110 = vmatprep.subr.bf16.mxu1 %v3361_v37 }
 0x225   : > { %3089 = vmatpush3.bf16.msra.mxu0 %v3362_v2 }
 0x226   : > { %3111 = vmatpush3.bf16.msra.mxu1 %v3363_v38  ;;  %3090 = vmatprep.subr.bf16.mxu0 %v3364_v39 }
 0x227   : > { %3112 = vmatprep.subr.bf16.mxu1 %v3365_v43 }
 0x229   : > { %3091 = vmatpush3.bf16.msra.mxu0 %v3366_v44 }
 0x22a   : > { %3113 = vmatpush3.bf16.msra.mxu1 %v3367_v47  ;;  %3092 = vmatprep.subr.bf16.mxu0 %v3368_v50 }
 0x22b   : > { %3114 = vmatprep.subr.bf16.mxu1 %v3369_v53 }
 0x22d   : > { %3093 = vmatpush3.bf16.msra.mxu0 %v3370_v54 }
 0x22e   : > { %3115 = vmatpush3.bf16.msra.mxu1 %v3371_v59  ;;  %3134 = vmatprep.subr.bf16.mxu0 %v3490_v63 }
 0x22f   : > { %3146 = vmatprep.subr.bf16.mxu1 %v3490_v63 }
 0x230   : > { %2399 = vmatmul.mubr.bf16.vlgmr.msra.gmra.mrb[28].mxu0 %v1085_v29 }
 0x231   : > { %2440 = vmatmul.mubr.bf16.vlgmr.msra.gmra.mrb[28].mxu1 %v1087_v30  ;;  %3135 = vmatpush3.bf16.msra.mxu0 %v3372_v60  ;;  %v2799_v30 = vld [vmem:[%s3996_s3] ss:$0 sm:$0xff] }
 0x232   : > { %3136 = vmatprep.subr.bf16.mxu0 %v3490_v63  ;;  %3142 = vmatprep.mubr.msk.bf16.mxu0 %vm3491_vm11, %v3490_v63 }
 0x233   : > { %3148 = vmatprep.mubr.msk.bf16.mxu1 %vm3491_vm11, %v3490_v63 }
 0x235   : > { %3137 = vmatpush3.bf16.msra.mxu0 %v3373_v19 }
 0x236   : > { %3138 = vmatprep.subr.bf16.mxu0 %v3490_v63 }
 0x239   : > { %3139 = vmatpush3.bf16.msra.mxu0 %v3374_v20 }
 0x23a   : > { %3140 = vmatprep.subr.bf16.mxu0 %v3490_v63 }
 0x23d   : > { %3141 = vmatpush3.bf16.msra.mxu0 %v3375_v27 }
 0x2a3   : > { %v2962_v28 = vpop.f32.mrb[16].mxu0  ;;  %v2984_v29 = vpop.f32.mrb[16].mxu1 }
 0x2a4   : > { %v2963_v10 = vpop.f32.mrb[17].mxu0  ;;  %v2985_v11 = vpop.f32.mrb[17].mxu1 }
 0x2a5   : > { %v2964_v3 = vadd.f32 %v2963_v10, %v2962_v28  ;;  %v2986_v48 = vadd.f32 %v2985_v11, %v2984_v29  ;;  %v2965_v0 = vpop.f32.mrb[18].mxu0  ;;  %v2987_v8 = vpop.f32.mrb[18].mxu1 }
 0x2a6   : > { %v2966_v49 = vpop.f32.mrb[19].mxu0  ;;  %v2988_v7 = vpop.f32.mrb[19].mxu1 }
 0x2a7   : > { %v2155_v9 = vadd.f32 %v2964_v3, %v2799_v30  ;;  %v2967_v41 = vadd.f32 %v2966_v49, %v2965_v0  ;;  %v2989_v42 = vadd.f32 %v2988_v7, %v2987_v8 }
 0x2a9   : > { %v2196_v45 = vadd.f32 %v2986_v48, %v2155_v9  ;;  %v2158_v46 = vadd.f32 %v2967_v41, %v2799_v30 }
 0x2ab   : > { %v2199_v51 = vadd.f32 %v2989_v42, %v2158_v46 }
 0x2c3   : > { %v3006_v34 = vpop.f32.mrb[20].mxu0  ;;  %v3028_v56 = vpop.f32.mrb[20].mxu1 }
 0x2c4   : > { %v3007_v40 = vpop.f32.mrb[21].mxu0  ;;  %v3029_v57 = vpop.f32.mrb[21].mxu1 }
 0x2c5   : > { %v3008_v58 = vadd.f32 %v3007_v40, %v3006_v34  ;;  %v3030_v61 = vadd.f32 %v3029_v57, %v3028_v56  ;;  %v3009_v6 = vpop.f32.mrb[22].mxu0  ;;  %v3031_v12 = vpop.f32.mrb[22].mxu1 }
 0x2c6   : > { %v3010_v13 = vpop.f32.mrb[23].mxu0  ;;  %v3032_v14 = vpop.f32.mrb[23].mxu1 }
 0x2c7   : > { %v2237_v15 = vadd.f32 %v3008_v58, %v2196_v45  ;;  %v3011_v16 = vadd.f32 %v3010_v13, %v3009_v6  ;;  %v3033_v17 = vadd.f32 %v3032_v14, %v3031_v12  ;;  %v2561_v58 = vld [vmem:[%s3999_s6] sm:$0x3] }
 0x2c9   : > { %v2278_v18 = vadd.f32 %v3030_v61, %v2237_v15  ;;  %v2240_v21 = vadd.f32 %v3011_v16, %v2199_v51  ;;  %v2569_v61 = vsel %vm678_vm2, %v2561_v58, 0 }
 0x2ca   : > { %3147 = vmatpush3.bf16.msra.mxu1 %v2569_v61 }
 0x2cb   : > { %v2281_v22 = vadd.f32 %v3033_v17, %v2240_v21  ;;  %3152 = vmatprep.subr.bf16.mxu1 %v3490_v63 }
 0x2e3   : > { %v3050_v25 = vpop.f32.mrb[24].mxu0 }
 0x2e4   : > { %v3072_v26 = vpop.f32.mrb[24].mxu1  ;;  %v3051_v36 = vpop.f32.mrb[25].mxu0 }
 0x2e5   : > { %v3052_v52 = vadd.f32 %v3051_v36, %v3050_v25  ;;  %v3073_v62 = vpop.f32.mrb[25].mxu1  ;;  %v3053_v55 = vpop.f32.mrb[26].mxu0  ;;  %v3378_v25 = vld [vmem:[%s3998_s5 + $0x10] sm:$0xff]  }
 0x2e6   : > { %v3074_v1 = vadd.f32 %v3073_v62, %v3072_v26  ;;  %v3075_v4 = vpop.f32.mrb[26].mxu1  ;;  %v3054_v5 = vpop.f32.mrb[27].mxu0  ;;  %v3379_v26 = vld [vmem:[%s3998_s5 + $0x18] sm:$0xff]  }
 0x2e7   : > { %v2319_v23 = vadd.f32 %v3052_v52, %v2278_v18  ;;  %v3055_v31 = vadd.f32 %v3054_v5, %v3053_v55  ;;  %v3076_v24 = vpop.f32.mrb[27].mxu1  ;;  %v3376_v18 = vld [vmem:[%s3998_s5] sm:$0xff]  }
 0x2e8   : > { %v3077_v32 = vadd.f32 %v3076_v24, %v3075_v4 }
 0x2e9   : > { %v2360_v33 = vadd.f32 %v3074_v1, %v2319_v23  ;;  %v2322_v35 = vadd.f32 %v3055_v31, %v2281_v22  ;;  %v3377_v22 = vld [vmem:[%s3998_s5 + $0x8] sm:$0xff]  }
 0x2eb   : > { %v2363_v37 = vadd.f32 %v3077_v32, %v2322_v35 }
 0x303   : > { %v3094_v2 = vpop.f32.mrb[28].mxu0 }
 0x304   : > { %v3116_v38 = vpop.f32.mrb[28].mxu1  ;;  %v3095_v39 = vpop.f32.mrb[29].mxu0 }
 0x305   : > { %v3096_v43 = vadd.f32 %v3095_v39, %v3094_v2  ;;  %v3117_v44 = vpop.f32.mrb[29].mxu1  ;;  %v3097_v47 = vpop.f32.mrb[30].mxu0 }
 0x306   : > { %v3118_v50 = vadd.f32 %v3117_v44, %v3116_v38  ;;  %v3119_v53 = vpop.f32.mrb[30].mxu1  ;;  %v3098_v54 = vpop.f32.mrb[31].mxu0 }
 0x307   : > { %v2401_v59 = vadd.f32 %v3096_v43, %v2360_v33  ;;  %v3099_v60 = vadd.f32 %v3098_v54, %v3097_v47  ;;  %v3120_v19 = vpop.f32.mrb[31].mxu1 }
 0x308   : > { %v3121_v20 = vadd.f32 %v3120_v19, %v3119_v53 }
 0x309   : > { %v2442_v27 = vadd.f32 %v3118_v50, %v2401_v59  ;;  %v2404_v28 = vadd.f32 %v3099_v60, %v2363_v37 }
 0x30b   : > { %v2445_v29 = vadd.f32 %v3121_v20, %v2404_v28  ;;  %v2449_v30 = vsel %vm2448_vm12, %v2442_v27, -inf }
 0x30c   : > { %2450 = vmax.xlane.f32.xlu0 %v2449_v30 }
 0x30d   : > { %v2480_v10 = vpack.c.bf16 %v2445_v29, %v2442_v27  ;;  %v2452_v11 = vsel %vm2448_vm12, %v2445_v29, -inf }
 0x30e   : > { %2453 = vmax.xlane.f32.xlu1 %v2452_v11 }
 0x30f   : > { %3143 = vmatmul.mubr.msk.bf16.vlgmr.msra.gmra.mrb[32].mxu0 %vm2513_vm13, %v2480_v10 }
 0x399   : > { %v2451_v3 = vpop.xlane.xlu0 %2450 }
 0x39a   : > { %v2455_v48 = vsub.f32 %v2442_v27, %v2451_v3 }
 0x39b   : > { %v2454_v0 = vpop.xlane.xlu1 %2453 }
 0x39c   : > { %v2457_v8 = vmul.f32 1.442695, %v2455_v48  ;;  %v2456_v49 = vsub.f32 %v2445_v29, %v2454_v0 }
 0x39e   : > { %3380 = vpow2.f32 %v2457_v8  ;;  %v2459_v7 = vmul.f32 1.442695, %v2456_v49 }
 0x3a0   : > { %3382 = vpow2.f32 %v2459_v7 }
 0x3a8   : > { %v3381_v9 = vpop.eup %3380 }
 0x3a9   : > { %2463 = vrot.lane.b32.xlu0 %v3381_v9, %s3492_s29 }
 0x3aa   : > { %v3383_v41 = vpop.eup %3382 }
 0x3ab   : > { %2465 = vrot.lane.b32.xlu1 %v3383_v41, %s3492_s29 }
 0x3e2   : > { %v2551_v42 = vpop.f32.mrb[32].mxu0 }
 0x3e3   : > { %v3144_v45 = vpop.f32.mrb[33].mxu0  ;;  %v2558_v36 = vmax.f32 %v2551_v42, 0.0 }
 0x3e4   : > { %v2554_v46 = vpop.f32.mrb[34].mxu0 }
 0x3e5   : > { %v3145_v51 = vpop.f32.mrb[35].mxu0  ;;  %v2559_v62 = vmax.f32 %v2554_v46, 0.0 }
 0x41b   : > { %v2464_v34 = vpop.permute.xlu0 %2463 }
 0x41c   : > { %v2470_v56 = vsel %vm2469_vm14, %v2464_v34, 0.0 }
 0x41d   : > { %v2466_v40 = vpop.permute.xlu1 %2465  ;;  %2471 = vadd.xlane.f32.xlu1 %v2470_v56 }
 0x41e   : > { %v2473_v57 = vsel %vm2469_vm14, %v2466_v40, 0.0 }
 0x41f   : > { %2474 = vadd.xlane.f32.xlu0 %v2473_v57 }
 0x4aa   : > { %v2472_v6 = vpop.xlane.xlu1 %2471 }
 0x4ab   : > { %3384 = vrcp.f32 %v2472_v6 }
 0x4ac   : > { %v2475_v12 = vpop.xlane.xlu0 %2474 }
 0x4ad   : > { %3386 = vrcp.f32 %v2475_v12 }
 0x4b5   : > { %v3385_v13 = vpop.eup %3384 }
 0x4b6   : > { %v2478_v15 = vmul.f32 %v3385_v13, %v3381_v9 }
 0x4b7   : > { %v3387_v14 = vpop.eup %3386 }
 0x4b8   : > { %v2479_v16 = vmul.f32 %v3387_v14, %v3383_v41 }
 0x4ba   : > { %v2560_v17 = vpack.c.bf16 %v2479_v16, %v2478_v15 }
 0x4bc   : > { %2563 = vrot.lane.b32.xlu0 %v2560_v17, %s3492_s29  ;;  %s2707_s29 = sshll.u32 %s289_s23, 4  ;;  %s3945_s29 = int_to_ptr.vmem [resolvable:$true] %s2707_s29 }
 0x4bd   : > { %s3416_s15 = scalar_lea.vmem %s3945_s29, 256  ;;  %p3423_p2 = scmp.lt.s32.totalorder %s3945_s29, %s3421_s13 }
 0x4be   : > { %p3417_p6 = scmp.ne.s32.totalorder %s3945_s29, %s3416_s15  ;;  %p3424_p3 = scmp.lt.s32.totalorder %s3422_s16, %s3416_s15 }
 0x4c0   : > { %p3418_p10 = pnand %p3417_p6, %p4011_p9  ;;  %p3425_p4 = por %p3424_p3, %p3423_p2 }
 0x4c2   : > { %p3419_p12 = pneg %p3418_p10 }
 0x4c4   : > { %p3426_p7 = pnand %p3425_p4, %p3419_p12 }
 0x52e   : > { %v2564_v21 = vpop.permute.xlu0 %2563 }
 0x52f   : > { %3149 = vmatmul.mubr.msk.bf16.vlgmr.msra.gmra.mrb[32].mxu1 %vm2469_vm14, %v2564_v21 }
 0x530   : > { %3153 = vmatpush3.bf16.msra.mxu1 %v3376_v18  ;;  %3160 = vmatprep.mubr.msk.bf16.mxu1 %vm3491_vm11, %v3490_v63 }
 0x531   : > { %3154 = vmatprep.subr.bf16.mxu1 %v3490_v63 }
 0x534   : > { %3155 = vmatpush3.bf16.msra.mxu1 %v3377_v22 }
 0x535   : > { %3156 = vmatprep.subr.bf16.mxu1 %v3490_v63 }
 0x538   : > { %3157 = vmatpush3.bf16.msra.mxu1 %v3378_v25 }
 0x539   : > { %3158 = vmatprep.subr.bf16.mxu1 %v3490_v63 }
 0x53c   : > { %3159 = vmatpush3.bf16.msra.mxu1 %v3379_v26 }
 0x602   : > { %v2605_v52 = vpop.f32.mrb[32].mxu1 }
 0x603   : > { %v2612_v55 = vmul.f32 %v2605_v52, %v2558_v36  ;;  %v3150_v1 = vpop.f32.mrb[33].mxu1 }
 0x604   : > { %v2608_v4 = vpop.f32.mrb[34].mxu1 }
 0x605   : > { %v2613_v5 = vmul.f32 %v2608_v4, %v2559_v62  ;;  %v3151_v23 = vpop.f32.mrb[35].mxu1 }
 0x607   : > { %v2614_v31 = vpack.c.bf16 %v2613_v5, %v2612_v55 }
 0x609   : > { %3161 = vmatmul.mubr.msk.bf16.vlgmr.msra.gmra.mrb[36].mxu1 %vm2513_vm13, %v2614_v31 }
 0x6dc   : > { %v2684_v63 = vpop.f32.mrb[36].mxu1 }
 0x6dd   : > { %2691 = vst [vmem:[%s289_s23] sm:$0xff] %v2684_v63  ;;  %v3162_v24 = vpop.f32.mrb[37].mxu1 }
 0x6de   : > { %v2687_v32 = vpop.f32.mrb[38].mxu1 }
 0x6df   : > { %2692 = vst [vmem:[%s289_s23 + $0x8] sm:$0xff] %v2687_v32  ;;  %v3163_v33 = vpop.f32.mrb[39].mxu1 }
 0x6e0   : > { %3429 = shalt.err (!%p3426_p7)
}
 0x6e1   : > { %s3430_s19 = scalar_lea.hbm %s3950_s17, 256  ;;  %s3434_s22 = scalar_lea.hbm %s4000_s7, 512 }
 0x6e2   : > { %p3431_p8 = scmp.ne.s32.totalorder %s3950_s17, %s3430_s19  ;;  %p3435_p1 = scmp.lt.u32.totalorder %s3950_s17, %s4000_s7 }
 0x6e3   : > { %p3436_p0 = scmp.lt.u32.totalorder %s3434_s22, %s3430_s19  ;;  %p3438_p6 = scmp.lt.u32.totalorder %s3430_s19, %s3950_s17 }
 0x6e4   : > { %p3432_p11 = pnand %p3431_p8, %p4011_p9 }
 0x6e5   : > { %p3437_p5 = por %p3436_p0, %p3435_p1 }
 0x6e6   : > { %p3433_p13 = pneg %p3432_p11 }
 0x6e7   : > { %p3439_p10 = por %p3438_p6, %p3437_p5 }
 0x6e9   : > { %p3440_p12 = pnand %p3439_p10, %p3433_p13 }
 0x6eb   : > { %3443 = shalt.err (!%p3440_p12)
}
 0x6ec   : > { %s3494_s9 = smov 128   ;;  %s3495_s14 = smov 8  }
 0x6ed   : > { %3168 = dma.vmem_to_hbm [thread:$0]  (%p4011_p9), %s3945_s29, 256, %s3950_s17, %s3952_s18, %s3494_s9, %s3494_s9, %s3495_s14  }
 0x6ee PF: > { %p3180_p2 = scmp.ge.s32.totalorder %s3482_s27, 2  ;;  %s2722_s15 = sand.u32 1, %s3470_s24  }
 0x6ef   : > { %p4012_p3 = scmp.ne.s32.totalorder %s4005_s12, 0  ;;  %s2723_s28 = scalar_lea.sflag [#allocation4], %s2722_s15 }
 0x6f1   : > { %p3175_p4 = pnand %p3180_p2, %p4012_p3 }
 0x6f3   : > { %3465 = dma.done.wait (!%p3175_p4), %s2723_s28, 256  }
 0x6f4   : > { %3467 = vsyncadd (!%p3175_p4), %s2723_s28, 4294967040  ;;  %p18_p7 = scmp.ge.s32.totalorder %s3561_s30, 4   ;;  %s4013_s24 = smov %s3474_s25 }
 0x6f5   : > { %s4014_s25 = smov %s3478_s26  ;;  %s4015_s26 = smov %s3572_s10 }
 0x6f6   : > { %s4016_s27 = smov %s3561_s30  ;;  %20 = sbr.rel (!%p18_p7) target bundleno = 4 (0x4), region = 88 }
 0x6fd   :  { %2728 = vsyncpa [#allocation3], 1 }
 0x6fe   :  { %2730 = vsyncpa [#allocation3 + $0x1], 1 }
 0x6ff   :  { %2731 = vsyncpa [#allocation4], 1 }
 0x700   :  { %2733 = vsyncpa [#allocation4 + $0x1], 1 }

</bundles_post_ra>
